<compile_context>
chip_gen: v7x
topology: tpu7x:2x2x1
jax: 0.10.0
libtpu: 0.0.40
codegen_flags: <defaults>
</compile_context>

<pallas_src>
import functools

import jax
import jax.numpy as jnp
from jax.experimental import pallas as pl
from jax.experimental.pallas import tpu as pltpu


def make_lstm_kernel(num_layers, seq_len, hidden_size):
    """Builds a Pallas kernel computing a stacked LSTM + final Linear.

    Kernel ref signature (all full-array VMEM blocks):
      x_ref:        (B, T, input_size)              batch-first (as in PyTorch)
      per layer l:  w_ih_t (in_l, 4H), w_hh_t (H, 4H), bias (1, 4H) = b_ih+b_hh
      w_fc_t:       (H, output_size)
      b_fc:         (1, output_size)
      out_ref:      (B, output_size)
    """
    H = hidden_size
    T = seq_len
    G = 4 * H

    def kernel(*refs):
        x_ref = refs[0]
        layer_refs = refs[1:1 + 3 * num_layers]
        wfc_ref = refs[1 + 3 * num_layers]
        bfc_ref = refs[2 + 3 * num_layers]
        out_ref = refs[3 + 3 * num_layers]

        B = x_ref.shape[0]

        # ---- Layer-0 input, re-ordered time-major: row index = t*B + b. ----
        # Tiny (T*B, in0) slab built once from VMEM-resident x; this replaces
        # the old wrapper-side XLA transpose (extra HBM round trip + dispatch).
        xb = [x_ref[b].astype(jnp.float32) for b in range(B)]          # (T, in0)
        rows = []
        for t in range(T):
            for b in range(B):
                rows.append(xb[b][t:t + 1, :])
        layer_in = jnp.concatenate(rows, axis=0)                        # (T*B, in0)

        outs = []
        for l in range(num_layers):
            w_ih = layer_refs[3 * l][...].astype(jnp.float32)           # (in_l, 4H)
            w_hh = layer_refs[3 * l + 1][...].astype(jnp.float32)       # (H, 4H)
            bias = layer_refs[3 * l + 2][...].astype(jnp.float32)       # (1, 4H)

            # cuDNN-style burst: ih projection for ALL timesteps in one
            # well-shaped (M = T*B) matmul, bias folded in here so the
            # recurrent loop below carries no bias add at all.
            g_all = jnp.dot(layer_in, w_ih, preferred_element_type=jnp.float32)
            g_all = g_all + jnp.broadcast_to(bias, (T * B, G))
            gates_ih = [g_all[t * B:(t + 1) * B, :] for t in range(T)]  # (B, 4H)

            # Recurrent chain: only h_prev @ W_hh^T (contraction = H) + gates.
            h = jnp.zeros((B, H), jnp.float32)
            c = jnp.zeros((B, H), jnp.float32)
            outs = []
            for t in range(T):
                gates = gates_ih[t] + jnp.dot(
                    h, w_hh, preferred_element_type=jnp.float32)
                # One full-width sigmoid over the whole (B, 4H) gates value,
                # one tanh on the g slice (3 EUP pushes per cell).
                sig = jax.nn.sigmoid(gates)
                i_g = sig[:, 0 * H:1 * H]
                f_g = sig[:, 1 * H:2 * H]
                o_g = sig[:, 3 * H:4 * H]
                g_g = jnp.tanh(gates[:, 2 * H:3 * H])
                c = f_g * c + i_g * g_g
                h = o_g * jnp.tanh(c)
                outs.append(h)

            if l + 1 < num_layers:
                # Next layer's input across time, already time-major.
                layer_in = jnp.concatenate(outs, axis=0)                # (T*B, H)

        # out[:, -1, :] of the top layer == final hidden state of top layer.
        w_fc = wfc_ref[...].astype(jnp.float32)                         # (H, O)
        b_fc = bfc_ref[...].astype(jnp.float32)                         # (1, O)
        last_h = outs[-1]                                               # (B, H)
        out = jnp.dot(last_h, w_fc, preferred_element_type=jnp.float32) + b_fc
        out_ref[...] = out.astype(out_ref.dtype)

    return kernel


def init_lstm_params(key, input_size, hidden_size, num_layers, output_size):
    """Deterministic init mimicking PyTorch's uniform(-1/sqrt(H), 1/sqrt(H))."""
    H = hidden_size
    k = 1.0 / jnp.sqrt(jnp.float32(H))
    params = {"layers": []}
    for l in range(num_layers):
        in_dim = input_size if l == 0 else H
        key, k1, k2, k3, k4 = jax.random.split(key, 5)
        w_ih = jax.random.uniform(k1, (4 * H, in_dim), jnp.float32, -k, k)
        w_hh = jax.random.uniform(k2, (4 * H, H), jnp.float32, -k, k)
        b_ih = jax.random.uniform(k3, (4 * H,), jnp.float32, -k, k)
        b_hh = jax.random.uniform(k4, (4 * H,), jnp.float32, -k, k)
        params["layers"].append((w_ih, w_hh, b_ih, b_hh))
    key, k5, k6 = jax.random.split(key, 3)
    params["w_fc"] = jax.random.uniform(k5, (output_size, H), jnp.float32, -k, k)
    params["b_fc"] = jax.random.uniform(k6, (output_size,), jnp.float32, -k, k)
    return params


def pack_lstm_params(params, hidden_size, output_size):
    """One-time packing (outside jit) into the kernel's preferred layout.

    Per layer (kept SEPARATE, per perf review — no fused [W_ih;W_hh] stack):
      w_ih_t = W_ih^T -> (in_l, 4H)
      w_hh_t = W_hh^T -> (H, 4H)
      bias   = b_ih + b_hh -> (1, 4H)
    Plus w_fc_t = W_fc^T -> (H, O), b_fc -> (1, O).
    """
    H = hidden_size
    packed = {"w_ih_t": [], "w_hh_t": [], "bias": []}
    for (w_ih, w_hh, b_ih, b_hh) in params["layers"]:
        packed["w_ih_t"].append(jnp.transpose(w_ih))
        packed["w_hh_t"].append(jnp.transpose(w_hh))
        packed["bias"].append((b_ih + b_hh).reshape(1, 4 * H))
    packed["w_fc_t"] = jnp.transpose(params["w_fc"])
    packed["b_fc"] = params["b_fc"].reshape(1, output_size)
    # Materialize now so none of this packing runs on the inference hot path.
    return jax.tree_util.tree_map(lambda a: jax.device_put(jnp.asarray(a)), packed)


@functools.partial(jax.jit, static_argnames=("hidden_size", "num_layers", "output_size"))
def lstm_model_forward(x, packed, *, hidden_size, num_layers, output_size):
    """x: (B, T, input_size) batch-first, like the PyTorch module.

    No wrapper-side transpose/reshape — x goes to the kernel as-is; the kernel
    does the (tiny) time-major re-ordering in VMEM.
    """
    B, T, _ = x.shape

    kernel_args = [x]
    for l in range(num_layers):
        kernel_args.append(packed["w_ih_t"][l])
        kernel_args.append(packed["w_hh_t"][l])
        kernel_args.append(packed["bias"][l])
    kernel_args.append(packed["w_fc_t"])
    kernel_args.append(packed["b_fc"])

    kernel = make_lstm_kernel(num_layers, T, hidden_size)

    vmem_spec = pl.BlockSpec(memory_space=pltpu.MemorySpace.VMEM)
    out = pl.pallas_call(
        kernel,
        out_shape=jax.ShapeDtypeStruct((B, output_size), jnp.float32),
        in_specs=[vmem_spec] * len(kernel_args),
        out_specs=vmem_spec,
    )(*kernel_args)
    return out


def lstm_model_reference(x, params, *, hidden_size, num_layers, output_size):
    """Pure-JAX reference with identical semantics (for verification)."""
    B, T, _ = x.shape
    H = hidden_size
    hs = [jnp.zeros((B, H), jnp.float32) for _ in range(num_layers)]
    cs = [jnp.zeros((B, H), jnp.float32) for _ in range(num_layers)]
    for t in range(T):
        layer_in = x[:, t, :].astype(jnp.float32)
        for l in range(num_layers):
            w_ih, w_hh, b_ih, b_hh = params["layers"][l]
            gates = layer_in @ w_ih.T + hs[l] @ w_hh.T + b_ih + b_hh
            i_g = jax.nn.sigmoid(gates[:, 0 * H:1 * H])
            f_g = jax.nn.sigmoid(gates[:, 1 * H:2 * H])
            g_g = jnp.tanh(gates[:, 2 * H:3 * H])
            o_g = jax.nn.sigmoid(gates[:, 3 * H:4 * H])
            cs[l] = f_g * cs[l] + i_g * g_g
            hs[l] = o_g * jnp.tanh(cs[l])
            layer_in = hs[l]
    return hs[-1] @ params["w_fc"].T + params["b_fc"]


if __name__ == "__main__":
    # Small shapes consistent with the module's forward:
    # batch=2, seq=8, input_size=16, hidden_size=32, num_layers=2, output_size=8
    B, T, INPUT, HIDDEN, LAYERS, OUT = 2, 8, 16, 32, 2, 8

    key = jax.random.PRNGKey(0)
    key, xk, pk = jax.random.split(key, 3)
    x = jax.random.normal(xk, (B, T, INPUT), jnp.float32)
    params = init_lstm_params(pk, INPUT, HIDDEN, LAYERS, OUT)
    packed = pack_lstm_params(params, HIDDEN, OUT)   # one-time, off the hot path

    y = lstm_model_forward(x, packed, hidden_size=HIDDEN, num_layers=LAYERS,
                           output_size=OUT)
    y = jax.block_until_ready(y)

    y_ref = lstm_model_reference(x, params, hidden_size=HIDDEN, num_layers=LAYERS,
                                 output_size=OUT)
    assert y.shape == (B, OUT)
    assert jnp.allclose(y, y_ref, atol=1e-5, rtol=1e-5), "Pallas output mismatch"

    print("KERNEL_OK")
</pallas_src>

<mosaic_0001>
module attributes {stable_mosaic.version = 11 : i64} {
  func.func @kernel(%arg0: memref<2x8x16xf32, #tpu.memory_space<vmem>>, %arg1: memref<16x128xf32, #tpu.memory_space<vmem>>, %arg2: memref<32x128xf32, #tpu.memory_space<vmem>>, %arg3: memref<1x128xf32, #tpu.memory_space<vmem>>, %arg4: memref<32x128xf32, #tpu.memory_space<vmem>>, %arg5: memref<32x128xf32, #tpu.memory_space<vmem>>, %arg6: memref<1x128xf32, #tpu.memory_space<vmem>>, %arg7: memref<32x8xf32, #tpu.memory_space<vmem>>, %arg8: memref<1x8xf32, #tpu.memory_space<vmem>>, %arg9: memref<2x8xf32, #tpu.memory_space<vmem>>) attributes {dimension_semantics = [], scalar_prefetch = 0 : i64, scratch_operands = 0 : i64, tpu.core_type = #tpu.core_type<tc>} {
    %c0 = arith.constant 0 : index
    %c0_0 = arith.constant 0 : index
    %c0_1 = arith.constant 0 : index
    %0 = vector.load %arg0[%c0, %c0_0, %c0_1] : memref<2x8x16xf32, #tpu.memory_space<vmem>>, vector<1x8x16xf32>
    %1 = vector.shape_cast %0 : vector<1x8x16xf32> to vector<8x16xf32>
    %c1 = arith.constant 1 : index
    %c0_2 = arith.constant 0 : index
    %c0_3 = arith.constant 0 : index
    %2 = vector.load %arg0[%c1, %c0_2, %c0_3] : memref<2x8x16xf32, #tpu.memory_space<vmem>>, vector<1x8x16xf32>
    %3 = vector.shape_cast %2 : vector<1x8x16xf32> to vector<8x16xf32>
    %4 = vector.extract_strided_slice %1 {offsets = [0, 0], sizes = [1, 16], strides = [1, 1]} : vector<8x16xf32> to vector<1x16xf32>
    %5 = vector.extract_strided_slice %3 {offsets = [0, 0], sizes = [1, 16], strides = [1, 1]} : vector<8x16xf32> to vector<1x16xf32>
    %6 = vector.extract_strided_slice %1 {offsets = [1, 0], sizes = [1, 16], strides = [1, 1]} : vector<8x16xf32> to vector<1x16xf32>
    %7 = vector.extract_strided_slice %3 {offsets = [1, 0], sizes = [1, 16], strides = [1, 1]} : vector<8x16xf32> to vector<1x16xf32>
    %8 = vector.extract_strided_slice %1 {offsets = [2, 0], sizes = [1, 16], strides = [1, 1]} : vector<8x16xf32> to vector<1x16xf32>
    %9 = vector.extract_strided_slice %3 {offsets = [2, 0], sizes = [1, 16], strides = [1, 1]} : vector<8x16xf32> to vector<1x16xf32>
    %10 = vector.extract_strided_slice %1 {offsets = [3, 0], sizes = [1, 16], strides = [1, 1]} : vector<8x16xf32> to vector<1x16xf32>
    %11 = vector.extract_strided_slice %3 {offsets = [3, 0], sizes = [1, 16], strides = [1, 1]} : vector<8x16xf32> to vector<1x16xf32>
    %12 = vector.extract_strided_slice %1 {offsets = [4, 0], sizes = [1, 16], strides = [1, 1]} : vector<8x16xf32> to vector<1x16xf32>
    %13 = vector.extract_strided_slice %3 {offsets = [4, 0], sizes = [1, 16], strides = [1, 1]} : vector<8x16xf32> to vector<1x16xf32>
    %14 = vector.extract_strided_slice %1 {offsets = [5, 0], sizes = [1, 16], strides = [1, 1]} : vector<8x16xf32> to vector<1x16xf32>
    %15 = vector.extract_strided_slice %3 {offsets = [5, 0], sizes = [1, 16], strides = [1, 1]} : vector<8x16xf32> to vector<1x16xf32>
    %16 = vector.extract_strided_slice %1 {offsets = [6, 0], sizes = [1, 16], strides = [1, 1]} : vector<8x16xf32> to vector<1x16xf32>
    %17 = vector.extract_strided_slice %3 {offsets = [6, 0], sizes = [1, 16], strides = [1, 1]} : vector<8x16xf32> to vector<1x16xf32>
    %18 = vector.extract_strided_slice %1 {offsets = [7, 0], sizes = [1, 16], strides = [1, 1]} : vector<8x16xf32> to vector<1x16xf32>
    %19 = vector.extract_strided_slice %3 {offsets = [7, 0], sizes = [1, 16], strides = [1, 1]} : vector<8x16xf32> to vector<1x16xf32>
    %20 = tpu.concatenate %4, %5, %6, %7, %8, %9, %10, %11, %12, %13, %14, %15, %16, %17, %18, %19 in 0 : vector<1x16xf32>, vector<1x16xf32>, vector<1x16xf32>, vector<1x16xf32>, vector<1x16xf32>, vector<1x16xf32>, vector<1x16xf32>, vector<1x16xf32>, vector<1x16xf32>, vector<1x16xf32>, vector<1x16xf32>, vector<1x16xf32>, vector<1x16xf32>, vector<1x16xf32>, vector<1x16xf32>, vector<1x16xf32> -> vector<16x16xf32>
    %c0_4 = arith.constant 0 : index
    %c0_5 = arith.constant 0 : index
    %21 = vector.load %arg1[%c0_4, %c0_5] : memref<16x128xf32, #tpu.memory_space<vmem>>, vector<16x128xf32>
    %c0_6 = arith.constant 0 : index
    %c0_7 = arith.constant 0 : index
    %22 = vector.load %arg2[%c0_6, %c0_7] : memref<32x128xf32, #tpu.memory_space<vmem>>, vector<32x128xf32>
    %c0_8 = arith.constant 0 : index
    %c0_9 = arith.constant 0 : index
    %23 = vector.load %arg3[%c0_8, %c0_9] : memref<1x128xf32, #tpu.memory_space<vmem>>, vector<1x128xf32>
    %cst = arith.constant dense<0.000000e+00> : vector<16x128xf32>
    %24 = tpu.matmul %20, %21, %cst {dimension_numbers = #tpu.dot_dimension_numbers<[1], [0], [0], [1], [0, 0, 1, 1], [], []>} : vector<16x16xf32>, vector<16x128xf32>, vector<16x128xf32> -> vector<16x128xf32>
    %25 = vector.shape_cast %23 : vector<1x128xf32> to vector<1x128xf32>
    %26 = vector.broadcast %25 : vector<1x128xf32> to vector<16x128xf32>
    %27 = arith.addf %24, %26 : vector<16x128xf32>
    %28 = vector.extract_strided_slice %27 {offsets = [0, 0], sizes = [2, 128], strides = [1, 1]} : vector<16x128xf32> to vector<2x128xf32>
    %29 = vector.extract_strided_slice %27 {offsets = [2, 0], sizes = [2, 128], strides = [1, 1]} : vector<16x128xf32> to vector<2x128xf32>
    %30 = vector.extract_strided_slice %27 {offsets = [4, 0], sizes = [2, 128], strides = [1, 1]} : vector<16x128xf32> to vector<2x128xf32>
    %31 = vector.extract_strided_slice %27 {offsets = [6, 0], sizes = [2, 128], strides = [1, 1]} : vector<16x128xf32> to vector<2x128xf32>
    %32 = vector.extract_strided_slice %27 {offsets = [8, 0], sizes = [2, 128], strides = [1, 1]} : vector<16x128xf32> to vector<2x128xf32>
    %33 = vector.extract_strided_slice %27 {offsets = [10, 0], sizes = [2, 128], strides = [1, 1]} : vector<16x128xf32> to vector<2x128xf32>
    %34 = vector.extract_strided_slice %27 {offsets = [12, 0], sizes = [2, 128], strides = [1, 1]} : vector<16x128xf32> to vector<2x128xf32>
    %35 = vector.extract_strided_slice %27 {offsets = [14, 0], sizes = [2, 128], strides = [1, 1]} : vector<16x128xf32> to vector<2x128xf32>
    %cst_10 = arith.constant 0.000000e+00 : f32
    %36 = vector.broadcast %cst_10 : f32 to vector<2x32xf32>
    %cst_11 = arith.constant 0.000000e+00 : f32
    %37 = vector.broadcast %cst_11 : f32 to vector<2x32xf32>
    %cst_12 = arith.constant dense<0.000000e+00> : vector<2x128xf32>
    %38 = tpu.matmul %36, %22, %cst_12 {dimension_numbers = #tpu.dot_dimension_numbers<[1], [0], [0], [1], [0, 0, 1, 1], [], []>} : vector<2x32xf32>, vector<32x128xf32>, vector<2x128xf32> -> vector<2x128xf32>
    %39 = arith.addf %28, %38 : vector<2x128xf32>
    %40 = arith.negf %39 : vector<2x128xf32>
    %41 = math.exp %40 : vector<2x128xf32>
    %cst_13 = arith.constant 1.000000e+00 : f32
    %42 = vector.broadcast %cst_13 : f32 to vector<2x128xf32>
    %43 = arith.addf %42, %41 : vector<2x128xf32>
    %44 = arith.divf %42, %43 : vector<2x128xf32>
    %45 = vector.extract_strided_slice %44 {offsets = [0, 0], sizes = [2, 32], strides = [1, 1]} : vector<2x128xf32> to vector<2x32xf32>
    %46 = vector.extract_strided_slice %44 {offsets = [0, 32], sizes = [2, 32], strides = [1, 1]} : vector<2x128xf32> to vector<2x32xf32>
    %47 = vector.extract_strided_slice %44 {offsets = [0, 96], sizes = [2, 32], strides = [1, 1]} : vector<2x128xf32> to vector<2x32xf32>
    %48 = vector.extract_strided_slice %39 {offsets = [0, 64], sizes = [2, 32], strides = [1, 1]} : vector<2x128xf32> to vector<2x32xf32>
    %49 = math.tanh %48 : vector<2x32xf32>
    %50 = arith.mulf %46, %37 : vector<2x32xf32>
    %51 = arith.mulf %45, %49 : vector<2x32xf32>
    %52 = arith.addf %50, %51 : vector<2x32xf32>
    %53 = math.tanh %52 : vector<2x32xf32>
    %54 = arith.mulf %47, %53 : vector<2x32xf32>
    %cst_14 = arith.constant dense<0.000000e+00> : vector<2x128xf32>
    %55 = tpu.matmul %54, %22, %cst_14 {dimension_numbers = #tpu.dot_dimension_numbers<[1], [0], [0], [1], [0, 0, 1, 1], [], []>} : vector<2x32xf32>, vector<32x128xf32>, vector<2x128xf32> -> vector<2x128xf32>
    %56 = arith.addf %29, %55 : vector<2x128xf32>
    %57 = arith.negf %56 : vector<2x128xf32>
    %58 = math.exp %57 : vector<2x128xf32>
    %cst_15 = arith.constant 1.000000e+00 : f32
    %59 = vector.broadcast %cst_15 : f32 to vector<2x128xf32>
    %60 = arith.addf %59, %58 : vector<2x128xf32>
    %61 = arith.divf %59, %60 : vector<2x128xf32>
    %62 = vector.extract_strided_slice %61 {offsets = [0, 0], sizes = [2, 32], strides = [1, 1]} : vector<2x128xf32> to vector<2x32xf32>
    %63 = vector.extract_strided_slice %61 {offsets = [0, 32], sizes = [2, 32], strides = [1, 1]} : vector<2x128xf32> to vector<2x32xf32>
    %64 = vector.extract_strided_slice %61 {offsets = [0, 96], sizes = [2, 32], strides = [1, 1]} : vector<2x128xf32> to vector<2x32xf32>
    %65 = vector.extract_strided_slice %56 {offsets = [0, 64], sizes = [2, 32], strides = [1, 1]} : vector<2x128xf32> to vector<2x32xf32>
    %66 = math.tanh %65 : vector<2x32xf32>
    %67 = arith.mulf %63, %52 : vector<2x32xf32>
    %68 = arith.mulf %62, %66 : vector<2x32xf32>
    %69 = arith.addf %67, %68 : vector<2x32xf32>
    %70 = math.tanh %69 : vector<2x32xf32>
    %71 = arith.mulf %64, %70 : vector<2x32xf32>
    %cst_16 = arith.constant dense<0.000000e+00> : vector<2x128xf32>
    %72 = tpu.matmul %71, %22, %cst_16 {dimension_numbers = #tpu.dot_dimension_numbers<[1], [0], [0], [1], [0, 0, 1, 1], [], []>} : vector<2x32xf32>, vector<32x128xf32>, vector<2x128xf32> -> vector<2x128xf32>
    %73 = arith.addf %30, %72 : vector<2x128xf32>
    %74 = arith.negf %73 : vector<2x128xf32>
    %75 = math.exp %74 : vector<2x128xf32>
    %cst_17 = arith.constant 1.000000e+00 : f32
    %76 = vector.broadcast %cst_17 : f32 to vector<2x128xf32>
    %77 = arith.addf %76, %75 : vector<2x128xf32>
    %78 = arith.divf %76, %77 : vector<2x128xf32>
    %79 = vector.extract_strided_slice %78 {offsets = [0, 0], sizes = [2, 32], strides = [1, 1]} : vector<2x128xf32> to vector<2x32xf32>
    %80 = vector.extract_strided_slice %78 {offsets = [0, 32], sizes = [2, 32], strides = [1, 1]} : vector<2x128xf32> to vector<2x32xf32>
    %81 = vector.extract_strided_slice %78 {offsets = [0, 96], sizes = [2, 32], strides = [1, 1]} : vector<2x128xf32> to vector<2x32xf32>
    %82 = vector.extract_strided_slice %73 {offsets = [0, 64], sizes = [2, 32], strides = [1, 1]} : vector<2x128xf32> to vector<2x32xf32>
    %83 = math.tanh %82 : vector<2x32xf32>
    %84 = arith.mulf %80, %69 : vector<2x32xf32>
    %85 = arith.mulf %79, %83 : vector<2x32xf32>
    %86 = arith.addf %84, %85 : vector<2x32xf32>
    %87 = math.tanh %86 : vector<2x32xf32>
    %88 = arith.mulf %81, %87 : vector<2x32xf32>
    %cst_18 = arith.constant dense<0.000000e+00> : vector<2x128xf32>
    %89 = tpu.matmul %88, %22, %cst_18 {dimension_numbers = #tpu.dot_dimension_numbers<[1], [0], [0], [1], [0, 0, 1, 1], [], []>} : vector<2x32xf32>, vector<32x128xf32>, vector<2x128xf32> -> vector<2x128xf32>
    %90 = arith.addf %31, %89 : vector<2x128xf32>
    %91 = arith.negf %90 : vector<2x128xf32>
    %92 = math.exp %91 : vector<2x128xf32>
    %cst_19 = arith.constant 1.000000e+00 : f32
    %93 = vector.broadcast %cst_19 : f32 to vector<2x128xf32>
    %94 = arith.addf %93, %92 : vector<2x128xf32>
    %95 = arith.divf %93, %94 : vector<2x128xf32>
    %96 = vector.extract_strided_slice %95 {offsets = [0, 0], sizes = [2, 32], strides = [1, 1]} : vector<2x128xf32> to vector<2x32xf32>
    %97 = vector.extract_strided_slice %95 {offsets = [0, 32], sizes = [2, 32], strides = [1, 1]} : vector<2x128xf32> to vector<2x32xf32>
    %98 = vector.extract_strided_slice %95 {offsets = [0, 96], sizes = [2, 32], strides = [1, 1]} : vector<2x128xf32> to vector<2x32xf32>
    %99 = vector.extract_strided_slice %90 {offsets = [0, 64], sizes = [2, 32], strides = [1, 1]} : vector<2x128xf32> to vector<2x32xf32>
    %100 = math.tanh %99 : vector<2x32xf32>
    %101 = arith.mulf %97, %86 : vector<2x32xf32>
    %102 = arith.mulf %96, %100 : vector<2x32xf32>
    %103 = arith.addf %101, %102 : vector<2x32xf32>
    %104 = math.tanh %103 : vector<2x32xf32>
    %105 = arith.mulf %98, %104 : vector<2x32xf32>
    %cst_20 = arith.constant dense<0.000000e+00> : vector<2x128xf32>
    %106 = tpu.matmul %105, %22, %cst_20 {dimension_numbers = #tpu.dot_dimension_numbers<[1], [0], [0], [1], [0, 0, 1, 1], [], []>} : vector<2x32xf32>, vector<32x128xf32>, vector<2x128xf32> -> vector<2x128xf32>
    %107 = arith.addf %32, %106 : vector<2x128xf32>
    %108 = arith.negf %107 : vector<2x128xf32>
    %109 = math.exp %108 : vector<2x128xf32>
    %cst_21 = arith.constant 1.000000e+00 : f32
    %110 = vector.broadcast %cst_21 : f32 to vector<2x128xf32>
    %111 = arith.addf %110, %109 : vector<2x128xf32>
    %112 = arith.divf %110, %111 : vector<2x128xf32>
    %113 = vector.extract_strided_slice %112 {offsets = [0, 0], sizes = [2, 32], strides = [1, 1]} : vector<2x128xf32> to vector<2x32xf32>
    %114 = vector.extract_strided_slice %112 {offsets = [0, 32], sizes = [2, 32], strides = [1, 1]} : vector<2x128xf32> to vector<2x32xf32>
    %115 = vector.extract_strided_slice %112 {offsets = [0, 96], sizes = [2, 32], strides = [1, 1]} : vector<2x128xf32> to vector<2x32xf32>
    %116 = vector.extract_strided_slice %107 {offsets = [0, 64], sizes = [2, 32], strides = [1, 1]} : vector<2x128xf32> to vector<2x32xf32>
    %117 = math.tanh %116 : vector<2x32xf32>
    %118 = arith.mulf %114, %103 : vector<2x32xf32>
    %119 = arith.mulf %113, %117 : vector<2x32xf32>
    %120 = arith.addf %118, %119 : vector<2x32xf32>
    %121 = math.tanh %120 : vector<2x32xf32>
    %122 = arith.mulf %115, %121 : vector<2x32xf32>
    %cst_22 = arith.constant dense<0.000000e+00> : vector<2x128xf32>
    %123 = tpu.matmul %122, %22, %cst_22 {dimension_numbers = #tpu.dot_dimension_numbers<[1], [0], [0], [1], [0, 0, 1, 1], [], []>} : vector<2x32xf32>, vector<32x128xf32>, vector<2x128xf32> -> vector<2x128xf32>
    %124 = arith.addf %33, %123 : vector<2x128xf32>
    %125 = arith.negf %124 : vector<2x128xf32>
    %126 = math.exp %125 : vector<2x128xf32>
    %cst_23 = arith.constant 1.000000e+00 : f32
    %127 = vector.broadcast %cst_23 : f32 to vector<2x128xf32>
    %128 = arith.addf %127, %126 : vector<2x128xf32>
    %129 = arith.divf %127, %128 : vector<2x128xf32>
    %130 = vector.extract_strided_slice %129 {offsets = [0, 0], sizes = [2, 32], strides = [1, 1]} : vector<2x128xf32> to vector<2x32xf32>
    %131 = vector.extract_strided_slice %129 {offsets = [0, 32], sizes = [2, 32], strides = [1, 1]} : vector<2x128xf32> to vector<2x32xf32>
    %132 = vector.extract_strided_slice %129 {offsets = [0, 96], sizes = [2, 32], strides = [1, 1]} : vector<2x128xf32> to vector<2x32xf32>
    %133 = vector.extract_strided_slice %124 {offsets = [0, 64], sizes = [2, 32], strides = [1, 1]} : vector<2x128xf32> to vector<2x32xf32>
    %134 = math.tanh %133 : vector<2x32xf32>
    %135 = arith.mulf %131, %120 : vector<2x32xf32>
    %136 = arith.mulf %130, %134 : vector<2x32xf32>
    %137 = arith.addf %135, %136 : vector<2x32xf32>
    %138 = math.tanh %137 : vector<2x32xf32>
    %139 = arith.mulf %132, %138 : vector<2x32xf32>
    %cst_24 = arith.constant dense<0.000000e+00> : vector<2x128xf32>
    %140 = tpu.matmul %139, %22, %cst_24 {dimension_numbers = #tpu.dot_dimension_numbers<[1], [0], [0], [1], [0, 0, 1, 1], [], []>} : vector<2x32xf32>, vector<32x128xf32>, vector<2x128xf32> -> vector<2x128xf32>
    %141 = arith.addf %34, %140 : vector<2x128xf32>
    %142 = arith.negf %141 : vector<2x128xf32>
    %143 = math.exp %142 : vector<2x128xf32>
    %cst_25 = arith.constant 1.000000e+00 : f32
    %144 = vector.broadcast %cst_25 : f32 to vector<2x128xf32>
    %145 = arith.addf %144, %143 : vector<2x128xf32>
    %146 = arith.divf %144, %145 : vector<2x128xf32>
    %147 = vector.extract_strided_slice %146 {offsets = [0, 0], sizes = [2, 32], strides = [1, 1]} : vector<2x128xf32> to vector<2x32xf32>
    %148 = vector.extract_strided_slice %146 {offsets = [0, 32], sizes = [2, 32], strides = [1, 1]} : vector<2x128xf32> to vector<2x32xf32>
    %149 = vector.extract_strided_slice %146 {offsets = [0, 96], sizes = [2, 32], strides = [1, 1]} : vector<2x128xf32> to vector<2x32xf32>
    %150 = vector.extract_strided_slice %141 {offsets = [0, 64], sizes = [2, 32], strides = [1, 1]} : vector<2x128xf32> to vector<2x32xf32>
    %151 = math.tanh %150 : vector<2x32xf32>
    %152 = arith.mulf %148, %137 : vector<2x32xf32>
    %153 = arith.mulf %147, %151 : vector<2x32xf32>
    %154 = arith.addf %152, %153 : vector<2x32xf32>
    %155 = math.tanh %154 : vector<2x32xf32>
    %156 = arith.mulf %149, %155 : vector<2x32xf32>
    %cst_26 = arith.constant dense<0.000000e+00> : vector<2x128xf32>
    %157 = tpu.matmul %156, %22, %cst_26 {dimension_numbers = #tpu.dot_dimension_numbers<[1], [0], [0], [1], [0, 0, 1, 1], [], []>} : vector<2x32xf32>, vector<32x128xf32>, vector<2x128xf32> -> vector<2x128xf32>
    %158 = arith.addf %35, %157 : vector<2x128xf32>
    %159 = arith.negf %158 : vector<2x128xf32>
    %160 = math.exp %159 : vector<2x128xf32>
    %cst_27 = arith.constant 1.000000e+00 : f32
    %161 = vector.broadcast %cst_27 : f32 to vector<2x128xf32>
    %162 = arith.addf %161, %160 : vector<2x128xf32>
    %163 = arith.divf %161, %162 : vector<2x128xf32>
    %164 = vector.extract_strided_slice %163 {offsets = [0, 0], sizes = [2, 32], strides = [1, 1]} : vector<2x128xf32> to vector<2x32xf32>
    %165 = vector.extract_strided_slice %163 {offsets = [0, 32], sizes = [2, 32], strides = [1, 1]} : vector<2x128xf32> to vector<2x32xf32>
    %166 = vector.extract_strided_slice %163 {offsets = [0, 96], sizes = [2, 32], strides = [1, 1]} : vector<2x128xf32> to vector<2x32xf32>
    %167 = vector.extract_strided_slice %158 {offsets = [0, 64], sizes = [2, 32], strides = [1, 1]} : vector<2x128xf32> to vector<2x32xf32>
    %168 = math.tanh %167 : vector<2x32xf32>
    %169 = arith.mulf %165, %154 : vector<2x32xf32>
    %170 = arith.mulf %164, %168 : vector<2x32xf32>
    %171 = arith.addf %169, %170 : vector<2x32xf32>
    %172 = math.tanh %171 : vector<2x32xf32>
    %173 = arith.mulf %166, %172 : vector<2x32xf32>
    %174 = tpu.concatenate %54, %71, %88, %105, %122, %139, %156, %173 in 0 : vector<2x32xf32>, vector<2x32xf32>, vector<2x32xf32>, vector<2x32xf32>, vector<2x32xf32>, vector<2x32xf32>, vector<2x32xf32>, vector<2x32xf32> -> vector<16x32xf32>
    %c0_28 = arith.constant 0 : index
    %c0_29 = arith.constant 0 : index
    %175 = vector.load %arg4[%c0_28, %c0_29] : memref<32x128xf32, #tpu.memory_space<vmem>>, vector<32x128xf32>
    %c0_30 = arith.constant 0 : index
    %c0_31 = arith.constant 0 : index
    %176 = vector.load %arg5[%c0_30, %c0_31] : memref<32x128xf32, #tpu.memory_space<vmem>>, vector<32x128xf32>
    %c0_32 = arith.constant 0 : index
    %c0_33 = arith.constant 0 : index
    %177 = vector.load %arg6[%c0_32, %c0_33] : memref<1x128xf32, #tpu.memory_space<vmem>>, vector<1x128xf32>
    %cst_34 = arith.constant dense<0.000000e+00> : vector<16x128xf32>
    %178 = tpu.matmul %174, %175, %cst_34 {dimension_numbers = #tpu.dot_dimension_numbers<[1], [0], [0], [1], [0, 0, 1, 1], [], []>} : vector<16x32xf32>, vector<32x128xf32>, vector<16x128xf32> -> vector<16x128xf32>
    %179 = vector.shape_cast %177 : vector<1x128xf32> to vector<1x128xf32>
    %180 = vector.broadcast %179 : vector<1x128xf32> to vector<16x128xf32>
    %181 = arith.addf %178, %180 : vector<16x128xf32>
    %182 = vector.extract_strided_slice %181 {offsets = [0, 0], sizes = [2, 128], strides = [1, 1]} : vector<16x128xf32> to vector<2x128xf32>
    %183 = vector.extract_strided_slice %181 {offsets = [2, 0], sizes = [2, 128], strides = [1, 1]} : vector<16x128xf32> to vector<2x128xf32>
    %184 = vector.extract_strided_slice %181 {offsets = [4, 0], sizes = [2, 128], strides = [1, 1]} : vector<16x128xf32> to vector<2x128xf32>
    %185 = vector.extract_strided_slice %181 {offsets = [6, 0], sizes = [2, 128], strides = [1, 1]} : vector<16x128xf32> to vector<2x128xf32>
    %186 = vector.extract_strided_slice %181 {offsets = [8, 0], sizes = [2, 128], strides = [1, 1]} : vector<16x128xf32> to vector<2x128xf32>
    %187 = vector.extract_strided_slice %181 {offsets = [10, 0], sizes = [2, 128], strides = [1, 1]} : vector<16x128xf32> to vector<2x128xf32>
    %188 = vector.extract_strided_slice %181 {offsets = [12, 0], sizes = [2, 128], strides = [1, 1]} : vector<16x128xf32> to vector<2x128xf32>
    %189 = vector.extract_strided_slice %181 {offsets = [14, 0], sizes = [2, 128], strides = [1, 1]} : vector<16x128xf32> to vector<2x128xf32>
    %cst_35 = arith.constant 0.000000e+00 : f32
    %190 = vector.broadcast %cst_35 : f32 to vector<2x32xf32>
    %cst_36 = arith.constant 0.000000e+00 : f32
    %191 = vector.broadcast %cst_36 : f32 to vector<2x32xf32>
    %cst_37 = arith.constant dense<0.000000e+00> : vector<2x128xf32>
    %192 = tpu.matmul %190, %176, %cst_37 {dimension_numbers = #tpu.dot_dimension_numbers<[1], [0], [0], [1], [0, 0, 1, 1], [], []>} : vector<2x32xf32>, vector<32x128xf32>, vector<2x128xf32> -> vector<2x128xf32>
    %193 = arith.addf %182, %192 : vector<2x128xf32>
    %194 = arith.negf %193 : vector<2x128xf32>
    %195 = math.exp %194 : vector<2x128xf32>
    %cst_38 = arith.constant 1.000000e+00 : f32
    %196 = vector.broadcast %cst_38 : f32 to vector<2x128xf32>
    %197 = arith.addf %196, %195 : vector<2x128xf32>
    %198 = arith.divf %196, %197 : vector<2x128xf32>
    %199 = vector.extract_strided_slice %198 {offsets = [0, 0], sizes = [2, 32], strides = [1, 1]} : vector<2x128xf32> to vector<2x32xf32>
    %200 = vector.extract_strided_slice %198 {offsets = [0, 32], sizes = [2, 32], strides = [1, 1]} : vector<2x128xf32> to vector<2x32xf32>
    %201 = vector.extract_strided_slice %198 {offsets = [0, 96], sizes = [2, 32], strides = [1, 1]} : vector<2x128xf32> to vector<2x32xf32>
    %202 = vector.extract_strided_slice %193 {offsets = [0, 64], sizes = [2, 32], strides = [1, 1]} : vector<2x128xf32> to vector<2x32xf32>
    %203 = math.tanh %202 : vector<2x32xf32>
    %204 = arith.mulf %200, %191 : vector<2x32xf32>
    %205 = arith.mulf %199, %203 : vector<2x32xf32>
    %206 = arith.addf %204, %205 : vector<2x32xf32>
    %207 = math.tanh %206 : vector<2x32xf32>
    %208 = arith.mulf %201, %207 : vector<2x32xf32>
    %cst_39 = arith.constant dense<0.000000e+00> : vector<2x128xf32>
    %209 = tpu.matmul %208, %176, %cst_39 {dimension_numbers = #tpu.dot_dimension_numbers<[1], [0], [0], [1], [0, 0, 1, 1], [], []>} : vector<2x32xf32>, vector<32x128xf32>, vector<2x128xf32> -> vector<2x128xf32>
    %210 = arith.addf %183, %209 : vector<2x128xf32>
    %211 = arith.negf %210 : vector<2x128xf32>
    %212 = math.exp %211 : vector<2x128xf32>
    %cst_40 = arith.constant 1.000000e+00 : f32
    %213 = vector.broadcast %cst_40 : f32 to vector<2x128xf32>
    %214 = arith.addf %213, %212 : vector<2x128xf32>
    %215 = arith.divf %213, %214 : vector<2x128xf32>
    %216 = vector.extract_strided_slice %215 {offsets = [0, 0], sizes = [2, 32], strides = [1, 1]} : vector<2x128xf32> to vector<2x32xf32>
    %217 = vector.extract_strided_slice %215 {offsets = [0, 32], sizes = [2, 32], strides = [1, 1]} : vector<2x128xf32> to vector<2x32xf32>
    %218 = vector.extract_strided_slice %215 {offsets = [0, 96], sizes = [2, 32], strides = [1, 1]} : vector<2x128xf32> to vector<2x32xf32>
    %219 = vector.extract_strided_slice %210 {offsets = [0, 64], sizes = [2, 32], strides = [1, 1]} : vector<2x128xf32> to vector<2x32xf32>
    %220 = math.tanh %219 : vector<2x32xf32>
    %221 = arith.mulf %217, %206 : vector<2x32xf32>
    %222 = arith.mulf %216, %220 : vector<2x32xf32>
    %223 = arith.addf %221, %222 : vector<2x32xf32>
    %224 = math.tanh %223 : vector<2x32xf32>
    %225 = arith.mulf %218, %224 : vector<2x32xf32>
    %cst_41 = arith.constant dense<0.000000e+00> : vector<2x128xf32>
    %226 = tpu.matmul %225, %176, %cst_41 {dimension_numbers = #tpu.dot_dimension_numbers<[1], [0], [0], [1], [0, 0, 1, 1], [], []>} : vector<2x32xf32>, vector<32x128xf32>, vector<2x128xf32> -> vector<2x128xf32>
    %227 = arith.addf %184, %226 : vector<2x128xf32>
    %228 = arith.negf %227 : vector<2x128xf32>
    %229 = math.exp %228 : vector<2x128xf32>
    %cst_42 = arith.constant 1.000000e+00 : f32
    %230 = vector.broadcast %cst_42 : f32 to vector<2x128xf32>
    %231 = arith.addf %230, %229 : vector<2x128xf32>
    %232 = arith.divf %230, %231 : vector<2x128xf32>
    %233 = vector.extract_strided_slice %232 {offsets = [0, 0], sizes = [2, 32], strides = [1, 1]} : vector<2x128xf32> to vector<2x32xf32>
    %234 = vector.extract_strided_slice %232 {offsets = [0, 32], sizes = [2, 32], strides = [1, 1]} : vector<2x128xf32> to vector<2x32xf32>
    %235 = vector.extract_strided_slice %232 {offsets = [0, 96], sizes = [2, 32], strides = [1, 1]} : vector<2x128xf32> to vector<2x32xf32>
    %236 = vector.extract_strided_slice %227 {offsets = [0, 64], sizes = [2, 32], strides = [1, 1]} : vector<2x128xf32> to vector<2x32xf32>
    %237 = math.tanh %236 : vector<2x32xf32>
    %238 = arith.mulf %234, %223 : vector<2x32xf32>
    %239 = arith.mulf %233, %237 : vector<2x32xf32>
    %240 = arith.addf %238, %239 : vector<2x32xf32>
    %241 = math.tanh %240 : vector<2x32xf32>
    %242 = arith.mulf %235, %241 : vector<2x32xf32>
    %cst_43 = arith.constant dense<0.000000e+00> : vector<2x128xf32>
    %243 = tpu.matmul %242, %176, %cst_43 {dimension_numbers = #tpu.dot_dimension_numbers<[1], [0], [0], [1], [0, 0, 1, 1], [], []>} : vector<2x32xf32>, vector<32x128xf32>, vector<2x128xf32> -> vector<2x128xf32>
    %244 = arith.addf %185, %243 : vector<2x128xf32>
    %245 = arith.negf %244 : vector<2x128xf32>
    %246 = math.exp %245 : vector<2x128xf32>
    %cst_44 = arith.constant 1.000000e+00 : f32
    %247 = vector.broadcast %cst_44 : f32 to vector<2x128xf32>
    %248 = arith.addf %247, %246 : vector<2x128xf32>
    %249 = arith.divf %247, %248 : vector<2x128xf32>
    %250 = vector.extract_strided_slice %249 {offsets = [0, 0], sizes = [2, 32], strides = [1, 1]} : vector<2x128xf32> to vector<2x32xf32>
    %251 = vector.extract_strided_slice %249 {offsets = [0, 32], sizes = [2, 32], strides = [1, 1]} : vector<2x128xf32> to vector<2x32xf32>
    %252 = vector.extract_strided_slice %249 {offsets = [0, 96], sizes = [2, 32], strides = [1, 1]} : vector<2x128xf32> to vector<2x32xf32>
    %253 = vector.extract_strided_slice %244 {offsets = [0, 64], sizes = [2, 32], strides = [1, 1]} : vector<2x128xf32> to vector<2x32xf32>
    %254 = math.tanh %253 : vector<2x32xf32>
    %255 = arith.mulf %251, %240 : vector<2x32xf32>
    %256 = arith.mulf %250, %254 : vector<2x32xf32>
    %257 = arith.addf %255, %256 : vector<2x32xf32>
    %258 = math.tanh %257 : vector<2x32xf32>
    %259 = arith.mulf %252, %258 : vector<2x32xf32>
    %cst_45 = arith.constant dense<0.000000e+00> : vector<2x128xf32>
    %260 = tpu.matmul %259, %176, %cst_45 {dimension_numbers = #tpu.dot_dimension_numbers<[1], [0], [0], [1], [0, 0, 1, 1], [], []>} : vector<2x32xf32>, vector<32x128xf32>, vector<2x128xf32> -> vector<2x128xf32>
    %261 = arith.addf %186, %260 : vector<2x128xf32>
    %262 = arith.negf %261 : vector<2x128xf32>
    %263 = math.exp %262 : vector<2x128xf32>
    %cst_46 = arith.constant 1.000000e+00 : f32
    %264 = vector.broadcast %cst_46 : f32 to vector<2x128xf32>
    %265 = arith.addf %264, %263 : vector<2x128xf32>
    %266 = arith.divf %264, %265 : vector<2x128xf32>
    %267 = vector.extract_strided_slice %266 {offsets = [0, 0], sizes = [2, 32], strides = [1, 1]} : vector<2x128xf32> to vector<2x32xf32>
    %268 = vector.extract_strided_slice %266 {offsets = [0, 32], sizes = [2, 32], strides = [1, 1]} : vector<2x128xf32> to vector<2x32xf32>
    %269 = vector.extract_strided_slice %266 {offsets = [0, 96], sizes = [2, 32], strides = [1, 1]} : vector<2x128xf32> to vector<2x32xf32>
    %270 = vector.extract_strided_slice %261 {offsets = [0, 64], sizes = [2, 32], strides = [1, 1]} : vector<2x128xf32> to vector<2x32xf32>
    %271 = math.tanh %270 : vector<2x32xf32>
    %272 = arith.mulf %268, %257 : vector<2x32xf32>
    %273 = arith.mulf %267, %271 : vector<2x32xf32>
    %274 = arith.addf %272, %273 : vector<2x32xf32>
    %275 = math.tanh %274 : vector<2x32xf32>
    %276 = arith.mulf %269, %275 : vector<2x32xf32>
    %cst_47 = arith.constant dense<0.000000e+00> : vector<2x128xf32>
    %277 = tpu.matmul %276, %176, %cst_47 {dimension_numbers = #tpu.dot_dimension_numbers<[1], [0], [0], [1], [0, 0, 1, 1], [], []>} : vector<2x32xf32>, vector<32x128xf32>, vector<2x128xf32> -> vector<2x128xf32>
    %278 = arith.addf %187, %277 : vector<2x128xf32>
    %279 = arith.negf %278 : vector<2x128xf32>
    %280 = math.exp %279 : vector<2x128xf32>
    %cst_48 = arith.constant 1.000000e+00 : f32
    %281 = vector.broadcast %cst_48 : f32 to vector<2x128xf32>
    %282 = arith.addf %281, %280 : vector<2x128xf32>
    %283 = arith.divf %281, %282 : vector<2x128xf32>
    %284 = vector.extract_strided_slice %283 {offsets = [0, 0], sizes = [2, 32], strides = [1, 1]} : vector<2x128xf32> to vector<2x32xf32>
    %285 = vector.extract_strided_slice %283 {offsets = [0, 32], sizes = [2, 32], strides = [1, 1]} : vector<2x128xf32> to vector<2x32xf32>
    %286 = vector.extract_strided_slice %283 {offsets = [0, 96], sizes = [2, 32], strides = [1, 1]} : vector<2x128xf32> to vector<2x32xf32>
    %287 = vector.extract_strided_slice %278 {offsets = [0, 64], sizes = [2, 32], strides = [1, 1]} : vector<2x128xf32> to vector<2x32xf32>
    %288 = math.tanh %287 : vector<2x32xf32>
    %289 = arith.mulf %285, %274 : vector<2x32xf32>
    %290 = arith.mulf %284, %288 : vector<2x32xf32>
    %291 = arith.addf %289, %290 : vector<2x32xf32>
    %292 = math.tanh %291 : vector<2x32xf32>
    %293 = arith.mulf %286, %292 : vector<2x32xf32>
    %cst_49 = arith.constant dense<0.000000e+00> : vector<2x128xf32>
    %294 = tpu.matmul %293, %176, %cst_49 {dimension_numbers = #tpu.dot_dimension_numbers<[1], [0], [0], [1], [0, 0, 1, 1], [], []>} : vector<2x32xf32>, vector<32x128xf32>, vector<2x128xf32> -> vector<2x128xf32>
    %295 = arith.addf %188, %294 : vector<2x128xf32>
    %296 = arith.negf %295 : vector<2x128xf32>
    %297 = math.exp %296 : vector<2x128xf32>
    %cst_50 = arith.constant 1.000000e+00 : f32
    %298 = vector.broadcast %cst_50 : f32 to vector<2x128xf32>
    %299 = arith.addf %298, %297 : vector<2x128xf32>
    %300 = arith.divf %298, %299 : vector<2x128xf32>
    %301 = vector.extract_strided_slice %300 {offsets = [0, 0], sizes = [2, 32], strides = [1, 1]} : vector<2x128xf32> to vector<2x32xf32>
    %302 = vector.extract_strided_slice %300 {offsets = [0, 32], sizes = [2, 32], strides = [1, 1]} : vector<2x128xf32> to vector<2x32xf32>
    %303 = vector.extract_strided_slice %300 {offsets = [0, 96], sizes = [2, 32], strides = [1, 1]} : vector<2x128xf32> to vector<2x32xf32>
    %304 = vector.extract_strided_slice %295 {offsets = [0, 64], sizes = [2, 32], strides = [1, 1]} : vector<2x128xf32> to vector<2x32xf32>
    %305 = math.tanh %304 : vector<2x32xf32>
    %306 = arith.mulf %302, %291 : vector<2x32xf32>
    %307 = arith.mulf %301, %305 : vector<2x32xf32>
    %308 = arith.addf %306, %307 : vector<2x32xf32>
    %309 = math.tanh %308 : vector<2x32xf32>
    %310 = arith.mulf %303, %309 : vector<2x32xf32>
    %cst_51 = arith.constant dense<0.000000e+00> : vector<2x128xf32>
    %311 = tpu.matmul %310, %176, %cst_51 {dimension_numbers = #tpu.dot_dimension_numbers<[1], [0], [0], [1], [0, 0, 1, 1], [], []>} : vector<2x32xf32>, vector<32x128xf32>, vector<2x128xf32> -> vector<2x128xf32>
    %312 = arith.addf %189, %311 : vector<2x128xf32>
    %313 = arith.negf %312 : vector<2x128xf32>
    %314 = math.exp %313 : vector<2x128xf32>
    %cst_52 = arith.constant 1.000000e+00 : f32
    %315 = vector.broadcast %cst_52 : f32 to vector<2x128xf32>
    %316 = arith.addf %315, %314 : vector<2x128xf32>
    %317 = arith.divf %315, %316 : vector<2x128xf32>
    %318 = vector.extract_strided_slice %317 {offsets = [0, 0], sizes = [2, 32], strides = [1, 1]} : vector<2x128xf32> to vector<2x32xf32>
    %319 = vector.extract_strided_slice %317 {offsets = [0, 32], sizes = [2, 32], strides = [1, 1]} : vector<2x128xf32> to vector<2x32xf32>
    %320 = vector.extract_strided_slice %317 {offsets = [0, 96], sizes = [2, 32], strides = [1, 1]} : vector<2x128xf32> to vector<2x32xf32>
    %321 = vector.extract_strided_slice %312 {offsets = [0, 64], sizes = [2, 32], strides = [1, 1]} : vector<2x128xf32> to vector<2x32xf32>
    %322 = math.tanh %321 : vector<2x32xf32>
    %323 = arith.mulf %319, %308 : vector<2x32xf32>
    %324 = arith.mulf %318, %322 : vector<2x32xf32>
    %325 = arith.addf %323, %324 : vector<2x32xf32>
    %326 = math.tanh %325 : vector<2x32xf32>
    %327 = arith.mulf %320, %326 : vector<2x32xf32>
    %c0_53 = arith.constant 0 : index
    %c0_54 = arith.constant 0 : index
    %328 = vector.load %arg7[%c0_53, %c0_54] : memref<32x8xf32, #tpu.memory_space<vmem>>, vector<32x8xf32>
    %c0_55 = arith.constant 0 : index
    %c0_56 = arith.constant 0 : index
    %329 = vector.load %arg8[%c0_55, %c0_56] : memref<1x8xf32, #tpu.memory_space<vmem>>, vector<1x8xf32>
    %cst_57 = arith.constant dense<0.000000e+00> : vector<2x8xf32>
    %330 = tpu.matmul %327, %328, %cst_57 {dimension_numbers = #tpu.dot_dimension_numbers<[1], [0], [0], [1], [0, 0, 1, 1], [], []>} : vector<2x32xf32>, vector<32x8xf32>, vector<2x8xf32> -> vector<2x8xf32>
    %331 = vector.broadcast %329 : vector<1x8xf32> to vector<2x8xf32>
    %332 = arith.addf %330, %331 : vector<2x8xf32>
    %c0_58 = arith.constant 0 : index
    %c0_59 = arith.constant 0 : index
    %333 = vector.load %arg9[%c0_58, %c0_59] : memref<2x8xf32, #tpu.memory_space<vmem>>, vector<2x8xf32>
    tpu.vector_store %arg9[%c0_58, %c0_59], %332 {strides = array<i32>} : memref<2x8xf32, #tpu.memory_space<vmem>>, vector<2x8xf32>,
    return
  }
}

</mosaic_0001>

<bundles_post_ra>
// kernel: lstm_model_forward.1
= control target key start
LH: loop header
LB: loop body
LE: loop exit
PB: predicated region body
PF: predicated region fallthrough
CT: control target
= control target key end

     0   :  { %14 = vsyncpa [#allocation3], 0  ;;  %s3266_s0 = inlined_call_operand.hbm [shape: f32[2,8,16], index: 0, kind: input, shape index: {}]   ;;  %s3267_s1 = inlined_call_operand.hbm [shape: f32[16,128], index: 1, kind: input, shape index: {}]   ;;  %s3268_s2 = inlined_call_operand.vmem [shape: f32[32,128], index: 2, kind: input, shape index: {}]   ;;  %s3269_s3 = inlined_call_operand.vmem [shape: f32[1,128], index: 3, kind: input, shape index: {}]   ;;  %s3270_s4 = inlined_call_operand.vmem [shape: f32[32,128], index: 4, kind: input, shape index: {}]   ;;  %s3271_s5 = inlined_call_operand.hbm [shape: f32[32,128], index: 5, kind: input, shape index: {}]   ;;  %s3272_s6 = inlined_call_operand.vmem [shape: f32[1,128], index: 6, kind: input, shape index: {}]   ;;  %s3273_s7 = inlined_call_operand.vmem [shape: f32[32,8], index: 7, kind: input, shape index: {}]   ;;  %s3274_s8 = inlined_call_operand.hbm [shape: f32[1,8], index: 8, kind: input, shape index: {}]   ;;  %s3275_s9 = inlined_call_operand.hbm [shape: f32[2,8], index: 9, kind: output, shape index: {}]  }
   0x1   :  { %15 = vsyncpa [#allocation6], 0 }
   0x2   :  { %16 = vsyncpa [#allocation9], 0 }
   0x3   :  { %17 = vsyncpa [#allocation4], 0  ;;  %s2839_s30 = smov [#allocation5]   ;;  %s2840_s11 = smov [#allocation2]  }
   0x4   :  { %s35_s10 = sshll.u32 %s2839_s30, 4  ;;  %s23_s12 = sshll.u32 %s2840_s11, 4  ;;  %s36_s10 = int_to_ptr.vmem [resolvable:$true] %s35_s10  ;;  %s2901_s12 = int_to_ptr.vmem [resolvable:$true] %s23_s12 }
   0x5   :  { %s2721_s15 = scalar_lea.hbm %s3267_s1, 256 }
   0x6   :  { %p2722_p0 = scmp.ne.s32.totalorder %s3267_s1, %s2721_s15  ;;  %p2725_p1 = scmp.lt.u32.totalorder %s2721_s15, %s3267_s1 }
   0x8   :  { %p2727_p2 = pnand %p2725_p1, %p2722_p0 }
   0xa   :  { %2730 = shalt.err (!%p2727_p2)
}
   0xb   :  { %s2731_s20 = scalar_lea.vmem %s36_s10, 256  ;;  %p2736_p4 = scmp.lt.s32.totalorder %s36_s10, %s36_s10 }
   0xc   :  { %p2732_p3 = scmp.ne.s32.totalorder %s36_s10, %s2731_s20  ;;  %p2737_p5 = scmp.lt.s32.totalorder %s2731_s20, %s2731_s20 }
   0xe   :  { %p2738_p6 = por %p2737_p5, %p2736_p4 }
  0x10   :  { %p2739_p7 = pnand %p2738_p6, %p2732_p3 }
  0x12   :  { %2742 = shalt.err (!%p2739_p7)
}
  0x13   :  { %s2841_s21 = smov 128   ;;  %s2842_s22 = smov 8  }
  0x14   :  { %41 = dma.hbm_to_vmem [thread:$0]  %s3267_s1, 256, %s36_s10, [#allocation6], %s2841_s21, %s2841_s21, %s2842_s22  }
  0x15   :  { %s2743_s27 = scalar_lea.hbm %s3266_s0, 256 }
  0x16   :  { %p2744_p8 = scmp.ne.s32.totalorder %s3266_s0, %s2743_s27  ;;  %p2747_p9 = scmp.lt.u32.totalorder %s2743_s27, %s3266_s0 }
  0x18   :  { %p2749_p10 = pnand %p2747_p9, %p2744_p8 }
  0x1a   :  { %2752 = shalt.err (!%p2749_p10)
}
  0x1b   :  { %s2753_s13 = scalar_lea.vmem %s2901_s12, 256  ;;  %p2758_p12 = scmp.lt.s32.totalorder %s2901_s12, %s2901_s12 }
  0x1c   :  { %p2754_p11 = scmp.ne.s32.totalorder %s2901_s12, %s2753_s13  ;;  %p2759_p13 = scmp.lt.s32.totalorder %s2753_s13, %s2753_s13 }
  0x1e   :  { %p2760_p0 = por %p2759_p13, %p2758_p12 }
  0x20   :  { %p2761_p1 = pnand %p2760_p0, %p2754_p11 }
  0x22   :  { %2764 = shalt.err (!%p2761_p1)
}
  0x23   :  { %29 = dma.hbm_to_vmem [thread:$0]  %s3266_s0, 256, %s2901_s12, [#allocation3], %s2841_s21, %s2841_s21, %s2842_s22  }
  0x24   :  { %s2843_s14 = smov [#allocation7]   ;;  %s2844_s16 = smov [#allocation8]  }
  0x25   :  { %s53_s15 = sshll.u32 %s2843_s14, 4  ;;  %s70_s17 = sshll.u32 %s2844_s16, 4  ;;  %s54_s15 = int_to_ptr.vmem [resolvable:$true] %s53_s15  ;;  %s71_s17 = int_to_ptr.vmem [resolvable:$true] %s70_s17 }
  0x26   :  { %s2765_s20 = scalar_lea.hbm %s3271_s5, 512 }
  0x27   :  { %p2766_p2 = scmp.ne.s32.totalorder %s3271_s5, %s2765_s20  ;;  %p2769_p3 = scmp.lt.u32.totalorder %s2765_s20, %s3271_s5 }
  0x29   :  { %p2771_p4 = pnand %p2769_p3, %p2766_p2 }
  0x2b   :  { %2774 = shalt.err (!%p2771_p4)
}
  0x2c   :  { %s2775_s0 = scalar_lea.vmem %s54_s15, 512  ;;  %p2780_p6 = scmp.lt.s32.totalorder %s54_s15, %s54_s15 }
  0x2d   :  { %p2776_p5 = scmp.ne.s32.totalorder %s54_s15, %s2775_s0  ;;  %p2781_p7 = scmp.lt.s32.totalorder %s2775_s0, %s2775_s0 }
  0x2f   :  { %p2782_p8 = por %p2781_p7, %p2780_p6 }
  0x31   :  { %p2783_p9 = pnand %p2782_p8, %p2776_p5 }
  0x33   :  { %2786 = shalt.err (!%p2783_p9)
}
  0x34   :  { %59 = dma.hbm_to_vmem [thread:$0]  %s3271_s5, 512, %s54_s15, [#allocation6], %s2841_s21, %s2841_s21, %s2842_s22  }
  0x35   :  { %s2787_s30 = scalar_lea.hbm %s3274_s8, 16 }
  0x36   :  { %p2788_p10 = scmp.ne.s32.totalorder %s3274_s8, %s2787_s30  ;;  %p2791_p11 = scmp.lt.u32.totalorder %s2787_s30, %s3274_s8 }
  0x38   :  { %p2793_p12 = pnand %p2791_p11, %p2788_p10 }
  0x3a   :  { %2796 = shalt.err (!%p2793_p12)
}
  0x3b   :  { %s2797_s14 = scalar_lea.vmem %s71_s17, 16  ;;  %s2801_s16 = scalar_lea.vmem %s71_s17, 32 }
  0x3c   :  { %p2798_p13 = scmp.ne.s32.totalorder %s71_s17, %s2797_s14  ;;  %p2802_p0 = scmp.lt.s32.totalorder %s71_s17, %s71_s17 }
  0x3d   :  { %p2803_p1 = scmp.lt.s32.totalorder %s2801_s16, %s2797_s14 }
  0x3f   :  { %p2804_p2 = por %p2803_p1, %p2802_p0 }
  0x41   :  { %p2805_p3 = pnand %p2804_p2, %p2798_p13 }
  0x43   :  { %2808 = shalt.err (!%p2805_p3)
}
  0x44   :  { %73 = dma.hbm_to_vmem [thread:$0]  %s3274_s8, 16, %s71_s17, [#allocation9]  }
  0x45   :  { %2831 = dma.done.wait [#allocation3], 256  }
  0x46   :  { %2832 = vsyncadd [#allocation3], 4294967040 }
  0x47   :  { %2833 = dma.done.wait [#allocation6], 768  }
  0x48   :  { %2834 = vsyncadd [#allocation6], 4294966528 }
  0x49   :  { %2835 = dma.done.wait [#allocation9], 16  }
  0x4a   :  { %2836 = vsyncadd [#allocation9], 4294967280  ;;  %v2845_v0 = vmov 0.0|0.0   ;;  %vm2846_vm0 = vmmov 0   ;;  %v2847_v1 = vmov 0.0   ;;  %v142_v2 = vld [vmem:[%s3268_s2] sm:$0xff] }
  0x4b   :  { %2471 = vmatprep.subr.bf16.mxu1 %v2845_v0  ;;  %2277 = vmatprep.mubr.msk.f32.mxu1 %vm2846_vm0, %v2847_v1  ;;  %v143_v3 = vld [vmem:[%s3268_s2 + $0x8] sm:$0xff]  ;;  %v140_v4 = vld [vmem:[#allocation5] sm:$0xff]  ;;  %vm119_vm1 = vcmask 1040384   ;;  %vm121_vm2 = vcmask 1041408   ;;  %v141_v6 = vld [vmem:[#allocation5 + $0x8] sm:$0xff]  ;;  %vm123_vm3 = vcmask 1042432  }
  0x4c   :  { %v2974_v5 = vpack.c.bf16 %v143_v3, %v142_v2  ;;  %v86_v7 = vld [vmem:[#allocation2] sm:$0xff]  ;;  %v88_v8 = vld [vmem:[#allocation2 + $0x8] sm:$0xff]  ;;  %vm125_vm4 = vcmask 1043456   ;;  %vm127_vm5 = vcmask 1044480   ;;  %v2467_v9 = vpack.c.bf16 %v141_v6, %v140_v4  ;;  %v144_v13 = vld [vmem:[%s3268_s2 + $0x10] sm:$0xff]  ;;  %s2848_s25 = smov 64  }
  0x4d   :  { %v90_v10 = vrot.slane %v88_v8, 7  ;;  %v93_v11 = vrot.slane %v86_v7, 7  ;;  %v95_v12 = vrot.slane %v88_v8, 6  ;;  %v145_v14 = vld [vmem:[%s3268_s2 + $0x18] sm:$0xff]  ;;  %v97_v15 = vrot.slane %v86_v7, 6  ;;  %s2850_s15 = smov [#allocation10]  }
  0x4e   :  { %2473 = vmatpush3.bf16.msra.mxu1 %v2974_v5  ;;  %v99_v16 = vrot.slane %v88_v8, 5  ;;  %v101_v17 = vrot.slane %v86_v7, 5  ;;  %vm129_vm6 = vcmask 1045504   ;;  %2468 = vmatprep.subr.bf16.mxu0 %v2467_v9  ;;  %v2985_v19 = vpack.c.bf16 %v145_v14, %v144_v13  ;;  %v2129_v42 = vld [vmem:[%s3269_s3] ss:$0 sm:$0xff]  ;;  %s2849_s3 = smov 32  }
  0x4f   :  { %2474 = vmatprep.subr.bf16.mxu1 %v2845_v0  ;;  %v120_v18 = vsel %vm119_vm1, %v86_v7, %v90_v10  ;;  %v105_v20 = vrot.slane %v86_v7, 4  ;;  %v107_v21 = vrot.slane %v88_v8, 3  ;;  %2470 = vmatpush3.bf16.msra.mxu0 %v2467_v9  ;;  %v109_v23 = vrot.slane %v86_v7, 3  ;;  %s2118_s18 = sshll.u32 %s2850_s15, 4  ;;  %s2119_s18 = int_to_ptr.vmem [resolvable:$true] %s2118_s18 }
  0x50   :  { %v122_v22 = vsel %vm121_vm2, %v120_v18, %v93_v11  ;;  %v111_v24 = vrot.slane %v88_v8, 2  ;;  %v113_v25 = vrot.slane %v86_v7, 2  ;;  %v103_v26 = vrot.slane %v88_v8, 4  ;;  %2477 = vmatprep.subr.bf16.mxu0 %v2845_v0  ;;  %p2814_p5 = scmp.lt.s32.totalorder %s2119_s18, %s2119_s18 }
  0x51   :  { %v124_v27 = vsel %vm123_vm3, %v122_v22, %v95_v12  ;;  %v115_v28 = vrot.slane %v88_v8, 1  ;;  %v133_v29 = vsel %vm119_vm1, %v105_v20, %v107_v21  ;;  %vm131_vm7 = vcmask 1046528  }
  0x52   :  { %v126_v30 = vsel %vm125_vm4, %v124_v27, %v97_v15  ;;  %2476 = vmatpush3.bf16.msra.mxu1 %v2985_v19  ;;  %v117_v31 = vrot.slane %v86_v7, 1  ;;  %v134_v32 = vsel %vm121_vm2, %v133_v29, %v109_v23  ;;  %vm153_vm8 = vcmask 130048  }
  0x53   :  { %v128_v33 = vsel %vm127_vm5, %v126_v30, %v99_v16  ;;  %v135_v34 = vsel %vm123_vm3, %v134_v32, %v111_v24  ;;  %2483 = vmatprep.subr.bf16.mxu1 %v2845_v0  ;;  %vm235_vm9 = vcmask 261120   ;;  %vm2110_vm10 = vcmask 58368  }
  0x54   :  { %v130_v35 = vsel %vm129_vm6, %v128_v33, %v101_v17  ;;  %v136_v36 = vsel %vm125_vm4, %v135_v34, %v113_v25 }
  0x55   :  { %v132_v37 = vsel %vm131_vm7, %v130_v35, %v103_v26  ;;  %v137_v38 = vsel %vm127_vm5, %v136_v36, %v115_v28  ;;  %2278 = vmatmul.mubr.f32.vlgmr.msra.gmra.mrb[0].mxu1 %v2847_v1 }
  0x56   :  { %2266 = vmatprep.mubr.msk.f32.mxu0 %vm153_vm8, %v132_v37  ;;  %v138_v39 = vsel %vm129_vm6, %v137_v38, %v117_v31  ;;  %2485 = vmatpush3.bf16.msra.mxu1 %v2974_v5 }
  0x57   :  { %v139_v40 = vsel %vm131_vm7, %v138_v39, %v88_v8  ;;  %2486 = vmatprep.subr.bf16.mxu1 %v2845_v0  ;;  %2299 = vmatprep.mubr.msk.f32.mxu1 %vm2846_vm0, %v2847_v1 }
  0x58   :  { %2267 = vmatmul.mubr.msk.f32.vlgmr.msra.gmra.mrb[0].mxu0 %vm153_vm8, %v139_v40 }
  0x59   :  { %2479 = vmatpush3.bf16.msra.mxu0 %v2974_v5  ;;  %2288 = vmatprep.mubr.msk.f32.mxu0 %vm2846_vm0, %v2847_v1 }
  0x5a   :  { %2480 = vmatprep.subr.bf16.mxu0 %v2845_v0  ;;  %2488 = vmatpush3.bf16.msra.mxu1 %v2985_v19 }
  0x5b   :  { %2495 = vmatprep.subr.bf16.mxu1 %v2845_v0 }
  0x5d   :  { %2482 = vmatpush3.bf16.msra.mxu0 %v2985_v19 }
  0x5e   :  { %2489 = vmatprep.subr.bf16.mxu0 %v2845_v0 }
 0x128   :  { %v305_v41 = vpop.f32.mrb[0].mxu1 }
 0x129   :  { %v2279_v43 = vpop.f32.mrb[1].mxu1 }
 0x12b   :  { %v2268_v44 = vpop.f32.mrb[0].mxu0 }
 0x12c   :  { %v3019_v45 = vadd.f32 %v2268_v44, %v2129_v42  ;;  %v226_v46 = vpop.f32.mrb[1].mxu0 }
 0x12d   :  { %v3021_v47 = vadd.f32 %v2129_v42, %v226_v46 }
 0x12f   :  { %v309_v48 = vadd.f32 %v305_v41, %v3021_v47 }
 0x131   :  { %2593 = vtanh.f32 %v309_v48  ;;  %v2132_v50 = vmul.f32 -1.442695, %v309_v48 }
 0x133   :  { %2595 = vpow2.f32 %v2132_v50 }
 0x13b   :  { %v2594_v49 = vpop.eup %2593 }
 0x13c   :  { %319 = vrot.lane.b32.xlu0 %v2594_v49, %s2848_s25 }
 0x13d   :  { %v2596_v51 = vpop.eup %2595 }
 0x13e   :  { %v313_v52 = vadd.f32 1.0, %v2596_v51 }
 0x140   :  { %2597 = vrcp.f32 %v313_v52 }
 0x14a   :  { %v2598_v53 = vpop.eup %2597 }
 0x14b   :  { %v317_v56 = vmul.f32 0.0, %v2598_v53 }
 0x1ae   :  { %v320_v54 = vpop.permute.xlu0 %319 }
 0x1af   :  { %v322_v55 = vmul.f32 %v2598_v53, %v320_v54 }
 0x1b1   :  { %324 = vrot.lane.b32.xlu0 %v322_v55, %s2849_s3 }
 0x223   :  { %v325_v57 = vpop.permute.xlu0 %324 }
 0x224   :  { %v327_v58 = vadd.f32 %v325_v57, %v317_v56 }
 0x226   :  { %2599 = vtanh.f32 %v327_v58  ;;  %v421_v13 = vrot.slane %v327_v58, 6 }
 0x230   :  { %v2600_v59 = vpop.eup %2599 }
 0x231   :  { %330 = vrot.lane.b32.xlu1 %v2600_v59, %s2848_s25 }
 0x2a3   :  { %v331_v60 = vpop.permute.xlu1 %330 }
 0x2a4   :  { %v3027_v61 = vmul.f32 %v2598_v53, %v331_v60 }
 0x2a6   :  { %335 = vrot.lane.b32.xlu1 %v3027_v61, %s2849_s3 }
 0x318   :  { %v336_v62 = vpop.permute.xlu1 %335 }
 0x319   :  { %2289 = vmatmul.mubr.msk.f32.vlgmr.msra.gmra.mrb[2].mxu0 %vm235_vm9, %v336_v62 }
 0x31a   :  { %2491 = vmatpush3.bf16.msra.mxu0 %v2974_v5  ;;  %2310 = vmatprep.mubr.msk.f32.mxu0 %vm2846_vm0, %v2847_v1 }
 0x31b   :  { %2492 = vmatprep.subr.bf16.mxu0 %v2845_v0 }
 0x31e   :  { %2494 = vmatpush3.bf16.msra.mxu0 %v2985_v19 }
 0x31f   :  { %2501 = vmatprep.subr.bf16.mxu0 %v2845_v0 }
 0x3ec   :  { %v405_v63 = vpop.f32.mrb[2].mxu0 }
 0x3ed   :  { %v410_v2 = vrot.slane %v405_v63, 6  ;;  %v2290_v3 = vpop.f32.mrb[3].mxu0 }
 0x3ef   :  { %v412_v4 = vadd.f32 %v410_v2, %v3021_v47 }
 0x3f1   :  { %2601 = vtanh.f32 %v412_v4  ;;  %v2134_v7 = vmul.f32 -1.442695, %v412_v4 }
 0x3f3   :  { %2603 = vpow2.f32 %v2134_v7 }
 0x3fb   :  { %v2602_v6 = vpop.eup %2601 }
 0x3fc   :  { %425 = vrot.lane.b32.xlu0 %v2602_v6, %s2848_s25 }
 0x3fd   :  { %v2604_v8 = vpop.eup %2603 }
 0x3fe   :  { %v416_v9 = vadd.f32 1.0, %v2604_v8 }
 0x400   :  { %2605 = vrcp.f32 %v416_v9 }
 0x40a   :  { %v2606_v10 = vpop.eup %2605 }
 0x40b   :  { %v423_v14 = vmul.f32 %v2606_v10, %v421_v13 }
 0x46e   :  { %v426_v11 = vpop.permute.xlu0 %425 }
 0x46f   :  { %v428_v12 = vmul.f32 %v2606_v10, %v426_v11 }
 0x471   :  { %430 = vrot.lane.b32.xlu1 %v428_v12, %s2849_s3 }
 0x4e3   :  { %v431_v15 = vpop.permute.xlu1 %430 }
 0x4e4   :  { %v433_v16 = vadd.f32 %v431_v15, %v423_v14 }
 0x4e6   :  { %2607 = vtanh.f32 %v433_v16  ;;  %v528_v34 = vrot.slane %v433_v16, 6 }
 0x4f0   :  { %v2608_v17 = vpop.eup %2607 }
 0x4f1   :  { %436 = vrot.lane.b32.xlu0 %v2608_v17, %s2848_s25 }
 0x563   :  { %v437_v18 = vpop.permute.xlu0 %436 }
 0x564   :  { %v439_v20 = vmul.f32 %v2606_v10, %v437_v18 }
 0x566   :  { %v441_v21 = vrot.slane %v439_v20, 2  ;;  %v1078_v41 = vsel %vm121_vm2, %v3027_v61, %v439_v20 }
 0x568   :  { %442 = vrot.lane.b32.xlu1 %v441_v21, %s2849_s3 }
 0x5da   :  { %v443_v22 = vpop.permute.xlu1 %442 }
 0x5db   :  { %2300 = vmatmul.mubr.msk.f32.vlgmr.msra.gmra.mrb[2].mxu1 %vm235_vm9, %v443_v22 }
 0x5dc   :  { %2497 = vmatpush3.bf16.msra.mxu1 %v2974_v5  ;;  %2321 = vmatprep.mubr.msk.f32.mxu1 %vm2846_vm0, %v2847_v1 }
 0x5dd   :  { %2498 = vmatprep.subr.bf16.mxu1 %v2845_v0 }
 0x5e0   :  { %2500 = vmatpush3.bf16.msra.mxu1 %v2985_v19 }
 0x5e1   :  { %2507 = vmatprep.subr.bf16.mxu1 %v2845_v0 }
 0x6ae   :  { %v512_v23 = vpop.f32.mrb[2].mxu1 }
 0x6af   :  { %v517_v24 = vrot.slane %v512_v23, 4  ;;  %v2301_v25 = vpop.f32.mrb[3].mxu1 }
 0x6b1   :  { %v519_v26 = vadd.f32 %v517_v24, %v3021_v47 }
 0x6b3   :  { %2609 = vtanh.f32 %v519_v26  ;;  %v2136_v28 = vmul.f32 -1.442695, %v519_v26 }
 0x6b5   :  { %2611 = vpow2.f32 %v2136_v28 }
 0x6bd   :  { %v2610_v27 = vpop.eup %2609 }
 0x6be   :  { %532 = vrot.lane.b32.xlu0 %v2610_v27, %s2848_s25 }
 0x6bf   :  { %v2612_v29 = vpop.eup %2611 }
 0x6c0   :  { %v523_v30 = vadd.f32 1.0, %v2612_v29 }
 0x6c2   :  { %2613 = vrcp.f32 %v523_v30 }
 0x6cc   :  { %v2614_v31 = vpop.eup %2613 }
 0x6cd   :  { %v530_v35 = vmul.f32 %v2614_v31, %v528_v34 }
 0x730   :  { %v533_v32 = vpop.permute.xlu0 %532 }
 0x731   :  { %v535_v33 = vmul.f32 %v2614_v31, %v533_v32 }
 0x733   :  { %537 = vrot.lane.b32.xlu1 %v535_v33, %s2849_s3 }
 0x7a5   :  { %v538_v36 = vpop.permute.xlu1 %537 }
 0x7a6   :  { %v540_v37 = vadd.f32 %v538_v36, %v530_v35 }
 0x7a8   :  { %2615 = vtanh.f32 %v540_v37  ;;  %v635_v58 = vrot.slane %v540_v37, 6 }
 0x7b2   :  { %v2616_v38 = vpop.eup %2615 }
 0x7b3   :  { %543 = vrot.lane.b32.xlu0 %v2616_v38, %s2848_s25 }
 0x825   :  { %v544_v39 = vpop.permute.xlu0 %543 }
 0x826   :  { %v546_v40 = vmul.f32 %v2614_v31, %v544_v39 }
 0x828   :  { %v548_v42 = vrot.slane %v546_v40, 4  ;;  %v1079_v43 = vsel %vm125_vm4, %v1078_v41, %v546_v40 }
 0x82a   :  { %549 = vrot.lane.b32.xlu1 %v548_v42, %s2849_s3 }
 0x89c   :  { %v550_v44 = vpop.permute.xlu1 %549 }
 0x89d   :  { %2311 = vmatmul.mubr.msk.f32.vlgmr.msra.gmra.mrb[4].mxu0 %vm235_vm9, %v550_v44 }
 0x89e   :  { %2503 = vmatpush3.bf16.msra.mxu0 %v2974_v5  ;;  %2332 = vmatprep.mubr.msk.f32.mxu0 %vm2846_vm0, %v2847_v1 }
 0x89f   :  { %2504 = vmatprep.subr.bf16.mxu0 %v2845_v0 }
 0x8a2   :  { %2506 = vmatpush3.bf16.msra.mxu0 %v2985_v19 }
 0x8a3   :  { %2513 = vmatprep.subr.bf16.mxu0 %v2845_v0 }
 0x970   :  { %v619_v46 = vpop.f32.mrb[4].mxu0 }
 0x971   :  { %v624_v48 = vrot.slane %v619_v46, 2  ;;  %v2312_v49 = vpop.f32.mrb[5].mxu0 }
 0x973   :  { %v626_v50 = vadd.f32 %v624_v48, %v3021_v47 }
 0x975   :  { %2617 = vtanh.f32 %v626_v50  ;;  %v2138_v52 = vmul.f32 -1.442695, %v626_v50 }
 0x977   :  { %2619 = vpow2.f32 %v2138_v52 }
 0x97f   :  { %v2618_v51 = vpop.eup %2617 }
 0x980   :  { %639 = vrot.lane.b32.xlu0 %v2618_v51, %s2848_s25 }
 0x981   :  { %v2620_v53 = vpop.eup %2619 }
 0x982   :  { %v630_v54 = vadd.f32 1.0, %v2620_v53 }
 0x984   :  { %2621 = vrcp.f32 %v630_v54 }
 0x98e   :  { %v2622_v55 = vpop.eup %2621 }
 0x98f   :  { %v637_v59 = vmul.f32 %v2622_v55, %v635_v58 }
 0x9f2   :  { %v640_v56 = vpop.permute.xlu0 %639 }
 0x9f3   :  { %v642_v57 = vmul.f32 %v2622_v55, %v640_v56 }
 0x9f5   :  { %644 = vrot.lane.b32.xlu1 %v642_v57, %s2849_s3 }
 0xa67   :  { %v645_v60 = vpop.permute.xlu1 %644 }
 0xa68   :  { %v647_v61 = vadd.f32 %v645_v60, %v637_v59 }
 0xa6a   :  { %2623 = vtanh.f32 %v647_v61  ;;  %v739_v16 = vrot.slane %v647_v61, 6 }
 0xa74   :  { %v2624_v47 = vpop.eup %2623 }
 0xa75   :  { %650 = vrot.lane.b32.xlu0 %v2624_v47, %s2848_s25 }
 0xae7   :  { %v651_v62 = vpop.permute.xlu0 %650 }
 0xae8   :  { %v653_v63 = vmul.f32 %v2622_v55, %v651_v62 }
 0xaea   :  { %v655_v2 = vrot.slane %v653_v63, 6  ;;  %v3070_v3 = vsel %vm129_vm6, %v1079_v43, %v653_v63 }
 0xaec   :  { %656 = vrot.lane.b32.xlu1 %v655_v2, %s2849_s3 }
 0xb5e   :  { %v657_v4 = vpop.permute.xlu1 %656 }
 0xb5f   :  { %2322 = vmatmul.mubr.msk.f32.vlgmr.msra.gmra.mrb[4].mxu1 %vm235_vm9, %v657_v4 }
 0xb60   :  { %2509 = vmatpush3.bf16.msra.mxu1 %v2974_v5  ;;  %2343 = vmatprep.mubr.msk.f32.mxu1 %vm2846_vm0, %v2847_v1 }
 0xb61   :  { %2510 = vmatprep.subr.bf16.mxu1 %v2845_v0 }
 0xb64   :  { %2512 = vmatpush3.bf16.msra.mxu1 %v2985_v19 }
 0xc32   :  { %v726_v6 = vpop.f32.mrb[4].mxu1 }
 0xc33   :  { %v730_v7 = vadd.f32 %v726_v6, %v3019_v45  ;;  %v2323_v8 = vpop.f32.mrb[5].mxu1 }
 0xc35   :  { %2625 = vtanh.f32 %v730_v7  ;;  %v2140_v10 = vmul.f32 -1.442695, %v730_v7 }
 0xc37   :  { %2627 = vpow2.f32 %v2140_v10 }
 0xc3f   :  { %v2626_v9 = vpop.eup %2625 }
 0xc40   :  { %743 = vrot.lane.b32.xlu0 %v2626_v9, %s2848_s25 }
 0xc41   :  { %v2628_v11 = vpop.eup %2627 }
 0xc42   :  { %v734_v12 = vadd.f32 1.0, %v2628_v11 }
 0xc44   :  { %2629 = vrcp.f32 %v734_v12 }
 0xc4e   :  { %v2630_v13 = vpop.eup %2629 }
 0xc4f   :  { %v741_v17 = vmul.f32 %v2630_v13, %v739_v16 }
 0xcb2   :  { %v744_v14 = vpop.permute.xlu0 %743 }
 0xcb3   :  { %v746_v15 = vmul.f32 %v2630_v13, %v744_v14 }
 0xcb5   :  { %748 = vrot.lane.b32.xlu1 %v746_v15, %s2849_s3 }
 0xd27   :  { %v749_v18 = vpop.permute.xlu1 %748 }
 0xd28   :  { %v751_v20 = vadd.f32 %v749_v18, %v741_v17 }
 0xd2a   :  { %2631 = vtanh.f32 %v751_v20 }
 0xd34   :  { %v2632_v21 = vpop.eup %2631 }
 0xd35   :  { %754 = vrot.lane.b32.xlu0 %v2632_v21, %s2848_s25 }
 0xda7   :  { %v755_v22 = vpop.permute.xlu0 %754 }
 0xda8   :  { %v3083_v23 = vmul.f32 %v2630_v13, %v755_v22  ;;  %v1084_v22 = vld [vmem:[%s3270_s4] sm:$0xff] }
 0xdaa   :  { %759 = vrot.lane.b32.xlu1 %v3083_v23, %s2849_s3 }
 0xe1c   :  { %v760_v24 = vpop.permute.xlu1 %759 }
 0xe1d   :  { %2333 = vmatmul.mubr.msk.f32.vlgmr.msra.gmra.mrb[6].mxu0 %vm235_vm9, %v760_v24  ;;  %v1088_v24 = vld [vmem:[#allocation7] sm:$0xff] }
 0xe1e   :  { %2515 = vmatpush3.bf16.msra.mxu0 %v2974_v5  ;;  %2354 = vmatprep.mubr.msk.f32.mxu0 %vm2846_vm0, %v2847_v1 }
 0xe1f   :  { %2516 = vmatprep.subr.bf16.mxu0 %v2845_v0 }
 0xe22   :  { %2518 = vmatpush3.bf16.msra.mxu0 %v2985_v19  ;;  %v845_v19 = vrot.slane %v751_v20, 6 }
 0xe23   :  { %2527 = vmatprep.subr.bf16.mxu0 %v2845_v0 }
 0xef0   :  { %v829_v25 = vpop.f32.mrb[6].mxu0 }
 0xef1   :  { %v834_v26 = vrot.slane %v829_v25, 6  ;;  %v2334_v27 = vpop.f32.mrb[7].mxu0 }
 0xef2   :  { %v1087_v27 = vld [vmem:[%s3270_s4 + $0x18] sm:$0xff] }
 0xef3   :  { %v836_v28 = vadd.f32 %v834_v26, %v3019_v45  ;;  %v1089_v26 = vld [vmem:[#allocation7 + $0x8] sm:$0xff] }
 0xef5   :  { %2633 = vtanh.f32 %v836_v28  ;;  %v2142_v30 = vmul.f32 -1.442695, %v836_v28  ;;  %v3129_v28 = vpack.c.bf16 %v1089_v26, %v1088_v24 }
 0xef7   :  { %2635 = vpow2.f32 %v2142_v30  ;;  %v1090_v30 = vld [vmem:[#allocation7 + $0x10] sm:$0xff] }
 0xeff   :  { %v2634_v29 = vpop.eup %2633 }
 0xf00   :  { %849 = vrot.lane.b32.xlu0 %v2634_v29, %s2848_s25 }
 0xf01   :  { %v2636_v5 = vpop.eup %2635 }
 0xf02   :  { %v840_v31 = vadd.f32 1.0, %v2636_v5  ;;  %v1091_v5 = vld [vmem:[#allocation7 + $0x18] sm:$0xff] }
 0xf04   :  { %2637 = vrcp.f32 %v840_v31  ;;  %v3132_v31 = vpack.c.bf16 %v1091_v5, %v1090_v30 }
 0xf0e   :  { %v2638_v32 = vpop.eup %2637 }
 0xf0f   :  { %v847_v35 = vmul.f32 %v2638_v32, %v845_v19 }
 0xf72   :  { %v850_v33 = vpop.permute.xlu0 %849 }
 0xf73   :  { %v852_v34 = vmul.f32 %v2638_v32, %v850_v33 }
 0xf75   :  { %854 = vrot.lane.b32.xlu1 %v852_v34, %s2849_s3 }
 0xfe7   :  { %v855_v36 = vpop.permute.xlu1 %854 }
 0xfe8   :  { %v857_v37 = vadd.f32 %v855_v36, %v847_v35 }
 0xfea   :  { %2639 = vtanh.f32 %v857_v37  ;;  %v952_v56 = vrot.slane %v857_v37, 6 }
 0xff4   :  { %v2640_v38 = vpop.eup %2639 }
 0xff5   :  { %860 = vrot.lane.b32.xlu0 %v2640_v38, %s2848_s25  ;;  %v2147_v38 = vld [vmem:[%s3272_s6] ss:$0 sm:$0xff] }
0x1067   :  { %v861_v39 = vpop.permute.xlu0 %860 }
0x1068   :  { %v863_v40 = vmul.f32 %v2638_v32, %v861_v39 }
0x106a   :  { %v865_v41 = vrot.slane %v863_v40, 2  ;;  %v1081_v62 = vsel %vm121_vm2, %v3083_v23, %v863_v40  ;;  %v1085_v23 = vld [vmem:[%s3270_s4 + $0x8] sm:$0xff] }
0x106b   :  { %v2519_v25 = vpack.c.bf16 %v1085_v23, %v1084_v22 }
0x106c   :  { %866 = vrot.lane.b32.xlu1 %v865_v41, %s2849_s3 }
0x106d   :  { %2520 = vmatprep.subr.bf16.mxu1 %v2519_v25 }
0x10de   :  { %v867_v42 = vpop.permute.xlu1 %866 }
0x10df   :  { %2344 = vmatmul.mubr.msk.f32.vlgmr.msra.gmra.mrb[6].mxu1 %vm235_vm9, %v867_v42 }
0x10e0   :  { %2522 = vmatpush3.bf16.msra.mxu1 %v2519_v25 }
0x11b2   :  { %v936_v43 = vpop.f32.mrb[6].mxu1 }
0x11b3   :  { %v941_v44 = vrot.slane %v936_v43, 4  ;;  %v2345_v46 = vpop.f32.mrb[7].mxu1 }
0x11b5   :  { %v943_v48 = vadd.f32 %v941_v44, %v3019_v45 }
0x11b7   :  { %2641 = vtanh.f32 %v943_v48  ;;  %v2144_v50 = vmul.f32 -1.442695, %v943_v48 }
0x11b9   :  { %2643 = vpow2.f32 %v2144_v50 }
0x11c1   :  { %v2642_v49 = vpop.eup %2641 }
0x11c2   :  { %956 = vrot.lane.b32.xlu0 %v2642_v49, %s2848_s25 }
0x11c3   :  { %v2644_v51 = vpop.eup %2643 }
0x11c4   :  { %v947_v52 = vadd.f32 1.0, %v2644_v51 }
0x11c6   :  { %2645 = vrcp.f32 %v947_v52 }
0x11d0   :  { %v2646_v53 = vpop.eup %2645 }
0x11d1   :  { %v954_v57 = vmul.f32 %v2646_v53, %v952_v56 }
0x1234   :  { %v957_v54 = vpop.permute.xlu0 %956 }
0x1235   :  { %v959_v55 = vmul.f32 %v2646_v53, %v957_v54 }
0x1237   :  { %961 = vrot.lane.b32.xlu1 %v959_v55, %s2849_s3 }
0x12a9   :  { %v962_v58 = vpop.permute.xlu1 %961 }
0x12aa   :  { %v964_v59 = vadd.f32 %v962_v58, %v954_v57 }
0x12ac   :  { %2647 = vtanh.f32 %v964_v59  ;;  %v1059_v17 = vrot.slane %v964_v59, 6 }
0x12b6   :  { %v2648_v60 = vpop.eup %2647 }
0x12b7   :  { %967 = vrot.lane.b32.xlu0 %v2648_v60, %s2848_s25 }
0x1329   :  { %v968_v61 = vpop.permute.xlu0 %967 }
0x132a   :  { %v970_v47 = vmul.f32 %v2646_v53, %v968_v61 }
0x132c   :  { %v972_v63 = vrot.slane %v970_v47, 4  ;;  %v1082_v2 = vsel %vm125_vm4, %v1081_v62, %v970_v47 }
0x132e   :  { %973 = vrot.lane.b32.xlu1 %v972_v63, %s2849_s3 }
0x13a0   :  { %v974_v4 = vpop.permute.xlu1 %973 }
0x13a1   :  { %2355 = vmatmul.mubr.msk.f32.vlgmr.msra.gmra.mrb[8].mxu0 %vm235_vm9, %v974_v4 }
0x13a2   :  { %2376 = vmatprep.mubr.msk.f32.mxu0 %vm2846_vm0, %v2847_v1  ;;  %2529 = vmatpush3.bf16.msra.mxu0 %v3129_v28 }
0x13a3   :  { %2530 = vmatprep.subr.bf16.mxu0 %v2845_v0 }
0x13a6   :  { %2532 = vmatpush3.bf16.msra.mxu0 %v3132_v31 }
0x13a7   :  { %2539 = vmatprep.subr.bf16.mxu0 %v2845_v0 }
0x13a9   :  { %2377 = vmatmul.mubr.f32.vlgmr.msra.gmra.mrb[10].mxu0 %v2847_v1 }
0x13aa   :  { %2541 = vmatpush3.bf16.msra.mxu0 %v3129_v28  ;;  %2398 = vmatprep.mubr.msk.f32.mxu0 %vm2846_vm0, %v2847_v1 }
0x13ab   :  { %2542 = vmatprep.subr.bf16.mxu0 %v2845_v0 }
0x13ae   :  { %2544 = vmatpush3.bf16.msra.mxu0 %v3132_v31 }
0x13af   :  { %2551 = vmatprep.subr.bf16.mxu0 %v2845_v0 }
0x1474   :  { %v1043_v6 = vpop.f32.mrb[8].mxu0 }
0x1475   :  { %v1048_v7 = vrot.slane %v1043_v6, 2  ;;  %v2356_v8 = vpop.f32.mrb[9].mxu0 }
0x1477   :  { %v1050_v9 = vadd.f32 %v1048_v7, %v3019_v45 }
0x1479   :  { %2649 = vtanh.f32 %v1050_v9  ;;  %v2146_v11 = vmul.f32 -1.442695, %v1050_v9 }
0x147b   :  { %2651 = vpow2.f32 %v2146_v11 }
0x147c   :  { %v1250_v36 = vpop.f32.mrb[10].mxu0 }
0x147d   :  { %v2378_v37 = vpop.f32.mrb[11].mxu0 }
0x1483   :  { %v2650_v10 = vpop.eup %2649 }
0x1484   :  { %1063 = vrot.lane.b32.xlu0 %v2650_v10, %s2848_s25 }
0x1485   :  { %v2652_v12 = vpop.eup %2651 }
0x1486   :  { %v1054_v13 = vadd.f32 1.0, %v2652_v12 }
0x1488   :  { %2653 = vrcp.f32 %v1054_v13 }
0x1492   :  { %v2654_v14 = vpop.eup %2653 }
0x1493   :  { %v1061_v18 = vmul.f32 %v2654_v14, %v1059_v17 }
0x14f6   :  { %v1064_v15 = vpop.permute.xlu0 %1063 }
0x14f7   :  { %v1066_v16 = vmul.f32 %v2654_v14, %v1064_v15 }
0x14f9   :  { %1068 = vrot.lane.b32.xlu1 %v1066_v16, %s2849_s3 }
0x14fd   :  { %1101 = vrot.lane.b32.xlu1 %v3070_v3, %s2849_s3  ;;  %v1086_v3 = vld [vmem:[%s3270_s4 + $0x10] sm:$0xff] }
0x14fe   :  { %v2523_v29 = vpack.c.bf16 %v1087_v27, %v1086_v3 }
0x1500   :  { %2524 = vmatprep.subr.bf16.mxu1 %v2523_v29 }
0x1501   :  { %2526 = vmatpush3.bf16.msra.mxu1 %v2523_v29 }
0x1502   :  { %2533 = vmatprep.subr.bf16.mxu1 %v2845_v0 }
0x156b   :  { %v1069_v45 = vpop.permute.xlu1 %1068 }
0x156c   :  { %v1071_v20 = vadd.f32 %v1069_v45, %v1061_v18 }
0x156e   :  { %2655 = vtanh.f32 %v1071_v20 }
0x156f   :  { %v1102_v21 = vpop.permute.xlu1 %1101 }
0x1570   :  { %2365 = vmatprep.mubr.msk.f32.mxu1 %vm235_vm9, %v1102_v21 }
0x1578   :  { %v2656_v32 = vpop.eup %2655 }
0x1579   :  { %1074 = vrot.lane.b32.xlu0 %v2656_v32, %s2848_s25 }
0x15eb   :  { %v1075_v33 = vpop.permute.xlu0 %1074 }
0x15ec   :  { %v1077_v34 = vmul.f32 %v2654_v14, %v1075_v33 }
0x15ee   :  { %v1083_v19 = vsel %vm129_vm6, %v1082_v2, %v1077_v34 }
0x15ef   :  { %1103 = vrot.lane.b32.xlu0 %v1083_v19, %s2849_s3 }
0x1661   :  { %v1104_v35 = vpop.permute.xlu0 %1103 }
0x1662   :  { %2366 = vmatmul.mubr.msk.f32.vlgmr.msra.gmra.mrb[8].mxu1 %vm235_vm9, %v1104_v35 }
0x1663   :  { %2535 = vmatpush3.bf16.msra.mxu1 %v3129_v28  ;;  %2387 = vmatprep.mubr.msk.f32.mxu1 %vm2846_vm0, %v2847_v1 }
0x1664   :  { %2536 = vmatprep.subr.bf16.mxu1 %v2845_v0 }
0x1667   :  { %2538 = vmatpush3.bf16.msra.mxu1 %v3132_v31 }
0x1668   :  { %2545 = vmatprep.subr.bf16.mxu1 %v2845_v0 }
0x1735   :  { %v2367_v39 = vpop.f32.mrb[8].mxu1 }
0x1736   :  { %v3158_v40 = vadd.f32 %v2367_v39, %v2147_v38  ;;  %v1175_v41 = vpop.f32.mrb[9].mxu1 }
0x1737   :  { %v3160_v42 = vadd.f32 %v2147_v38, %v1175_v41 }
0x1739   :  { %v1254_v43 = vadd.f32 %v1250_v36, %v3160_v42 }
0x173b   :  { %2657 = vtanh.f32 %v1254_v43  ;;  %v2150_v46 = vmul.f32 -1.442695, %v1254_v43 }
0x173d   :  { %2659 = vpow2.f32 %v2150_v46 }
0x1745   :  { %v2658_v44 = vpop.eup %2657 }
0x1746   :  { %1264 = vrot.lane.b32.xlu1 %v2658_v44, %s2848_s25 }
0x1747   :  { %v2660_v48 = vpop.eup %2659 }
0x1748   :  { %v1258_v49 = vadd.f32 1.0, %v2660_v48 }
0x174a   :  { %2661 = vrcp.f32 %v1258_v49 }
0x1754   :  { %v2662_v50 = vpop.eup %2661 }
0x1755   :  { %v1262_v53 = vmul.f32 0.0, %v2662_v50 }
0x17b8   :  { %v1265_v51 = vpop.permute.xlu1 %1264 }
0x17b9   :  { %v1267_v52 = vmul.f32 %v2662_v50, %v1265_v51 }
0x17bb   :  { %1269 = vrot.lane.b32.xlu0 %v1267_v52, %s2849_s3 }
0x182d   :  { %v1270_v54 = vpop.permute.xlu0 %1269 }
0x182e   :  { %v1272_v55 = vadd.f32 %v1270_v54, %v1262_v53 }
0x1830   :  { %2663 = vtanh.f32 %v1272_v55  ;;  %v1366_v10 = vrot.slane %v1272_v55, 6 }
0x183a   :  { %v2664_v56 = vpop.eup %2663 }
0x183b   :  { %1275 = vrot.lane.b32.xlu1 %v2664_v56, %s2848_s25 }
0x18ad   :  { %v1276_v57 = vpop.permute.xlu1 %1275 }
0x18ae   :  { %v1278_v58 = vmul.f32 %v2662_v50, %v1276_v57 }
0x18b0   :  { %1280 = vrot.lane.b32.xlu0 %v1278_v58, %s2849_s3 }
0x1922   :  { %v1281_v59 = vpop.permute.xlu0 %1280 }
0x1923   :  { %2388 = vmatmul.mubr.msk.f32.vlgmr.msra.gmra.mrb[10].mxu1 %vm235_vm9, %v1281_v59 }
0x1924   :  { %2547 = vmatpush3.bf16.msra.mxu1 %v3129_v28  ;;  %2409 = vmatprep.mubr.msk.f32.mxu1 %vm2846_vm0, %v2847_v1 }
0x1925   :  { %2548 = vmatprep.subr.bf16.mxu1 %v2845_v0 }
0x1928   :  { %2550 = vmatpush3.bf16.msra.mxu1 %v3132_v31 }
0x1929   :  { %2557 = vmatprep.subr.bf16.mxu1 %v2845_v0 }
0x19f6   :  { %v1350_v60 = vpop.f32.mrb[10].mxu1 }
0x19f7   :  { %v1355_v61 = vrot.slane %v1350_v60, 6  ;;  %v2389_v47 = vpop.f32.mrb[11].mxu1 }
0x19f9   :  { %v1357_v62 = vadd.f32 %v1355_v61, %v3160_v42 }
0x19fb   :  { %2665 = vtanh.f32 %v1357_v62  ;;  %v2152_v2 = vmul.f32 -1.442695, %v1357_v62 }
0x19fd   :  { %2667 = vpow2.f32 %v2152_v2 }
0x1a05   :  { %v2666_v63 = vpop.eup %2665 }
0x1a06   :  { %1370 = vrot.lane.b32.xlu1 %v2666_v63, %s2848_s25 }
0x1a07   :  { %v2668_v4 = vpop.eup %2667 }
0x1a08   :  { %v1361_v6 = vadd.f32 1.0, %v2668_v4 }
0x1a0a   :  { %2669 = vrcp.f32 %v1361_v6 }
0x1a14   :  { %v2670_v7 = vpop.eup %2669 }
0x1a15   :  { %v1368_v11 = vmul.f32 %v2670_v7, %v1366_v10 }
0x1a78   :  { %v1371_v8 = vpop.permute.xlu1 %1370 }
0x1a79   :  { %v1373_v9 = vmul.f32 %v2670_v7, %v1371_v8 }
0x1a7b   :  { %1375 = vrot.lane.b32.xlu0 %v1373_v9, %s2849_s3 }
0x1aed   :  { %v1376_v12 = vpop.permute.xlu0 %1375 }
0x1aee   :  { %v1378_v13 = vadd.f32 %v1376_v12, %v1368_v11 }
0x1af0   :  { %2671 = vtanh.f32 %v1378_v13  ;;  %v1473_v30 = vrot.slane %v1378_v13, 6 }
0x1afa   :  { %v2672_v14 = vpop.eup %2671 }
0x1afb   :  { %1381 = vrot.lane.b32.xlu1 %v2672_v14, %s2848_s25 }
0x1b6d   :  { %v1382_v15 = vpop.permute.xlu1 %1381 }
0x1b6e   :  { %v1384_v16 = vmul.f32 %v2670_v7, %v1382_v15 }
0x1b70   :  { %v1386_v17 = vrot.slane %v1384_v16, 2 }
0x1b72   :  { %1387 = vrot.lane.b32.xlu0 %v1386_v17, %s2849_s3 }
0x1be4   :  { %v1388_v18 = vpop.permute.xlu0 %1387 }
0x1be5   :  { %2399 = vmatmul.mubr.msk.f32.vlgmr.msra.gmra.mrb[12].mxu0 %vm235_vm9, %v1388_v18 }
0x1be6   :  { %2553 = vmatpush3.bf16.msra.mxu0 %v3129_v28  ;;  %2420 = vmatprep.mubr.msk.f32.mxu0 %vm2846_vm0, %v2847_v1 }
0x1be7   :  { %2554 = vmatprep.subr.bf16.mxu0 %v2845_v0 }
0x1bea   :  { %2556 = vmatpush3.bf16.msra.mxu0 %v3132_v31 }
0x1beb   :  { %2563 = vmatprep.subr.bf16.mxu0 %v2845_v0 }
0x1cb8   :  { %v1457_v45 = vpop.f32.mrb[12].mxu0 }
0x1cb9   :  { %v1462_v20 = vrot.slane %v1457_v45, 4  ;;  %v2400_v21 = vpop.f32.mrb[13].mxu0 }
0x1cbb   :  { %v1464_v22 = vadd.f32 %v1462_v20, %v3160_v42 }
0x1cbd   :  { %2673 = vtanh.f32 %v1464_v22  ;;  %v2154_v24 = vmul.f32 -1.442695, %v1464_v22 }
0x1cbf   :  { %2675 = vpow2.f32 %v2154_v24 }
0x1cc7   :  { %v2674_v23 = vpop.eup %2673 }
0x1cc8   :  { %1477 = vrot.lane.b32.xlu1 %v2674_v23, %s2848_s25 }
0x1cc9   :  { %v2676_v25 = vpop.eup %2675 }
0x1cca   :  { %v1468_v26 = vadd.f32 1.0, %v2676_v25 }
0x1ccc   :  { %2677 = vrcp.f32 %v1468_v26 }
0x1cd6   :  { %v2678_v3 = vpop.eup %2677 }
0x1cd7   :  { %v1475_v5 = vmul.f32 %v2678_v3, %v1473_v30 }
0x1d3a   :  { %v1478_v27 = vpop.permute.xlu1 %1477 }
0x1d3b   :  { %v1480_v29 = vmul.f32 %v2678_v3, %v1478_v27 }
0x1d3d   :  { %1482 = vrot.lane.b32.xlu0 %v1480_v29, %s2849_s3 }
0x1daf   :  { %v1483_v32 = vpop.permute.xlu0 %1482 }
0x1db0   :  { %v1485_v33 = vadd.f32 %v1483_v32, %v1475_v5 }
0x1db2   :  { %2679 = vtanh.f32 %v1485_v33  ;;  %v1580_v53 = vrot.slane %v1485_v33, 6 }
0x1dbc   :  { %v2680_v34 = vpop.eup %2679 }
0x1dbd   :  { %1488 = vrot.lane.b32.xlu1 %v2680_v34, %s2848_s25 }
0x1e2f   :  { %v1489_v19 = vpop.permute.xlu1 %1488 }
0x1e30   :  { %v1491_v35 = vmul.f32 %v2678_v3, %v1489_v19 }
0x1e32   :  { %v1493_v36 = vrot.slane %v1491_v35, 4 }
0x1e34   :  { %1494 = vrot.lane.b32.xlu0 %v1493_v36, %s2849_s3 }
0x1ea6   :  { %v1495_v37 = vpop.permute.xlu0 %1494 }
0x1ea7   :  { %2410 = vmatmul.mubr.msk.f32.vlgmr.msra.gmra.mrb[12].mxu1 %vm235_vm9, %v1495_v37 }
0x1ea8   :  { %2559 = vmatpush3.bf16.msra.mxu1 %v3129_v28  ;;  %2431 = vmatprep.mubr.msk.f32.mxu1 %vm2846_vm0, %v2847_v1 }
0x1ea9   :  { %2560 = vmatprep.subr.bf16.mxu1 %v2845_v0 }
0x1eac   :  { %2562 = vmatpush3.bf16.msra.mxu1 %v3132_v31 }
0x1ead   :  { %2569 = vmatprep.subr.bf16.mxu1 %v2845_v0 }
0x1f7a   :  { %v1564_v38 = vpop.f32.mrb[12].mxu1 }
0x1f7b   :  { %v1569_v39 = vrot.slane %v1564_v38, 2  ;;  %v2411_v41 = vpop.f32.mrb[13].mxu1 }
0x1f7d   :  { %v1571_v43 = vadd.f32 %v1569_v39, %v3160_v42 }
0x1f7f   :  { %2681 = vtanh.f32 %v1571_v43  ;;  %v2156_v46 = vmul.f32 -1.442695, %v1571_v43 }
0x1f81   :  { %2683 = vpow2.f32 %v2156_v46 }
0x1f89   :  { %v2682_v44 = vpop.eup %2681 }
0x1f8a   :  { %1584 = vrot.lane.b32.xlu1 %v2682_v44, %s2848_s25 }
0x1f8b   :  { %v2684_v48 = vpop.eup %2683 }
0x1f8c   :  { %v1575_v49 = vadd.f32 1.0, %v2684_v48 }
0x1f8e   :  { %2685 = vrcp.f32 %v1575_v49 }
0x1f98   :  { %v2686_v50 = vpop.eup %2685 }
0x1f99   :  { %v1582_v54 = vmul.f32 %v2686_v50, %v1580_v53 }
0x1ffc   :  { %v1585_v51 = vpop.permute.xlu1 %1584 }
0x1ffd   :  { %v1587_v52 = vmul.f32 %v2686_v50, %v1585_v51 }
0x1fff   :  { %1589 = vrot.lane.b32.xlu0 %v1587_v52, %s2849_s3 }
0x2071   :  { %v1590_v55 = vpop.permute.xlu0 %1589 }
0x2072   :  { %v1592_v56 = vadd.f32 %v1590_v55, %v1582_v54 }
0x2074   :  { %2687 = vtanh.f32 %v1592_v56  ;;  %v1684_v10 = vrot.slane %v1592_v56, 6 }
0x207e   :  { %v2688_v42 = vpop.eup %2687 }
0x207f   :  { %1595 = vrot.lane.b32.xlu1 %v2688_v42, %s2848_s25 }
0x20f1   :  { %v1596_v57 = vpop.permute.xlu1 %1595 }
0x20f2   :  { %v1598_v58 = vmul.f32 %v2686_v50, %v1596_v57 }
0x20f4   :  { %v1600_v59 = vrot.slane %v1598_v58, 6 }
0x20f6   :  { %1601 = vrot.lane.b32.xlu0 %v1600_v59, %s2849_s3 }
0x2168   :  { %v1602_v60 = vpop.permute.xlu0 %1601 }
0x2169   :  { %2421 = vmatmul.mubr.msk.f32.vlgmr.msra.gmra.mrb[14].mxu0 %vm235_vm9, %v1602_v60 }
0x216a   :  { %2565 = vmatpush3.bf16.msra.mxu0 %v3129_v28  ;;  %2442 = vmatprep.mubr.msk.f32.mxu0 %vm2846_vm0, %v2847_v1 }
0x216b   :  { %2566 = vmatprep.subr.bf16.mxu0 %v2845_v0 }
0x216e   :  { %2568 = vmatpush3.bf16.msra.mxu0 %v3132_v31 }
0x216f   :  { %2575 = vmatprep.subr.bf16.mxu0 %v2845_v0 }
0x223c   :  { %v1671_v61 = vpop.f32.mrb[14].mxu0 }
0x223d   :  { %v1675_v47 = vadd.f32 %v1671_v61, %v3158_v40  ;;  %v2422_v62 = vpop.f32.mrb[15].mxu0 }
0x223f   :  { %2689 = vtanh.f32 %v1675_v47  ;;  %v2158_v2 = vmul.f32 -1.442695, %v1675_v47 }
0x2241   :  { %2691 = vpow2.f32 %v2158_v2 }
0x2249   :  { %v2690_v63 = vpop.eup %2689 }
0x224a   :  { %1688 = vrot.lane.b32.xlu1 %v2690_v63, %s2848_s25 }
0x224b   :  { %v2692_v4 = vpop.eup %2691 }
0x224c   :  { %v1679_v6 = vadd.f32 1.0, %v2692_v4 }
0x224e   :  { %2693 = vrcp.f32 %v1679_v6 }
0x2258   :  { %v2694_v7 = vpop.eup %2693 }
0x2259   :  { %v1686_v11 = vmul.f32 %v2694_v7, %v1684_v10 }
0x22bc   :  { %v1689_v8 = vpop.permute.xlu1 %1688 }
0x22bd   :  { %v1691_v9 = vmul.f32 %v2694_v7, %v1689_v8 }
0x22bf   :  { %1693 = vrot.lane.b32.xlu0 %v1691_v9, %s2849_s3 }
0x2331   :  { %v1694_v12 = vpop.permute.xlu0 %1693 }
0x2332   :  { %v1696_v13 = vadd.f32 %v1694_v12, %v1686_v11  ;;  %v2024_v11 = vld [vmem:[%s3273_s7 + $0x8] sm:$0xff]  ;;  %v2025_v12 = vld [vmem:[%s3273_s7 + $0x10] sm:$0xff] }
0x2334   :  { %2695 = vtanh.f32 %v1696_v13 }
0x233e   :  { %v2696_v14 = vpop.eup %2695 }
0x233f   :  { %1699 = vrot.lane.b32.xlu1 %v2696_v14, %s2848_s25  ;;  %v2026_v14 = vld [vmem:[%s3273_s7 + $0x18] sm:$0xff] }
0x23b1   :  { %v1700_v15 = vpop.permute.xlu1 %1699 }
0x23b2   :  { %v1702_v16 = vmul.f32 %v2694_v7, %v1700_v15  ;;  %v2579_v15 = vpack.c.bf16 %v2026_v14, %v2025_v12 }
0x23b4   :  { %1704 = vrot.lane.b32.xlu0 %v1702_v16, %s2849_s3 }
0x2426   :  { %v1705_v17 = vpop.permute.xlu0 %1704 }
0x2427   :  { %2432 = vmatmul.mubr.msk.f32.vlgmr.msra.gmra.mrb[14].mxu1 %vm235_vm9, %v1705_v17 }
0x2428   :  { %2571 = vmatpush3.bf16.msra.mxu1 %v3129_v28  ;;  %2453 = vmatprep.mubr.msk.f32.mxu1 %vm2846_vm0, %v2847_v1 }
0x2429   :  { %2572 = vmatprep.subr.bf16.mxu1 %v2845_v0 }
0x242c   :  { %2574 = vmatpush3.bf16.msra.mxu1 %v3132_v31  ;;  %v1790_v31 = vrot.slane %v1696_v13, 6 }
0x24fa   :  { %v1774_v18 = vpop.f32.mrb[14].mxu1 }
0x24fb   :  { %v1779_v45 = vrot.slane %v1774_v18, 6  ;;  %v2433_v20 = vpop.f32.mrb[15].mxu1 }
0x24fd   :  { %v1781_v21 = vadd.f32 %v1779_v45, %v3158_v40 }
0x24ff   :  { %2697 = vtanh.f32 %v1781_v21  ;;  %v2160_v23 = vmul.f32 -1.442695, %v1781_v21  ;;  %v2165_v21 = vld [vmem:[#allocation8] ss:$0 sm:$0xff] }
0x2501   :  { %2699 = vpow2.f32 %v2160_v23 }
0x2509   :  { %v2698_v22 = vpop.eup %2697 }
0x250a   :  { %1794 = vrot.lane.b32.xlu1 %v2698_v22, %s2848_s25 }
0x250b   :  { %v2700_v24 = vpop.eup %2699 }
0x250c   :  { %v1785_v28 = vadd.f32 1.0, %v2700_v24 }
0x250e   :  { %2701 = vrcp.f32 %v1785_v28 }
0x2518   :  { %v2702_v25 = vpop.eup %2701 }
0x2519   :  { %v1792_v27 = vmul.f32 %v2702_v25, %v1790_v31 }
0x257c   :  { %v1795_v26 = vpop.permute.xlu1 %1794 }
0x257d   :  { %v1797_v3 = vmul.f32 %v2702_v25, %v1795_v26 }
0x257f   :  { %1799 = vrot.lane.b32.xlu0 %v1797_v3, %s2849_s3 }
0x25f1   :  { %v1800_v29 = vpop.permute.xlu0 %1799 }
0x25f2   :  { %v1802_v30 = vadd.f32 %v1800_v29, %v1792_v27 }
0x25f4   :  { %2703 = vtanh.f32 %v1802_v30 }
0x25fe   :  { %v2704_v5 = vpop.eup %2703 }
0x25ff   :  { %1805 = vrot.lane.b32.xlu1 %v2704_v5, %s2848_s25 }
0x2671   :  { %v1806_v32 = vpop.permute.xlu1 %1805 }
0x2672   :  { %v1808_v33 = vmul.f32 %v2702_v25, %v1806_v32 }
0x2674   :  { %v1810_v34 = vrot.slane %v1808_v33, 2 }
0x2676   :  { %1811 = vrot.lane.b32.xlu0 %v1810_v34, %s2849_s3 }
0x26e8   :  { %v1812_v19 = vpop.permute.xlu0 %1811 }
0x26e9   :  { %2443 = vmatmul.mubr.msk.f32.vlgmr.msra.gmra.mrb[16].mxu0 %vm235_vm9, %v1812_v19 }
0x26ea   :  { %2464 = vmatprep.mubr.msk.f32.mxu0 %vm2846_vm0, %v2847_v1  ;;  %v1897_v1 = vrot.slane %v1802_v30, 6 }
0x27bc   :  { %v1881_v35 = vpop.f32.mrb[16].mxu0 }
0x27bd   :  { %v1886_v36 = vrot.slane %v1881_v35, 4  ;;  %v2444_v37 = vpop.f32.mrb[17].mxu0 }
0x27bf   :  { %v1888_v38 = vadd.f32 %v1886_v36, %v3158_v40 }
0x27c1   :  { %2705 = vtanh.f32 %v1888_v38  ;;  %v2162_v41 = vmul.f32 -1.442695, %v1888_v38 }
0x27c3   :  { %2707 = vpow2.f32 %v2162_v41 }
0x27cb   :  { %v2706_v39 = vpop.eup %2705 }
0x27cc   :  { %1901 = vrot.lane.b32.xlu1 %v2706_v39, %s2848_s25 }
0x27cd   :  { %v2708_v43 = vpop.eup %2707 }
0x27ce   :  { %v1892_v44 = vadd.f32 1.0, %v2708_v43 }
0x27d0   :  { %2709 = vrcp.f32 %v1892_v44 }
0x27da   :  { %v2710_v46 = vpop.eup %2709 }
0x27db   :  { %v1899_v50 = vmul.f32 %v2710_v46, %v1897_v1 }
0x283e   :  { %v1902_v48 = vpop.permute.xlu1 %1901 }
0x283f   :  { %v1904_v49 = vmul.f32 %v2710_v46, %v1902_v48 }
0x2841   :  { %1906 = vrot.lane.b32.xlu0 %v1904_v49, %s2849_s3 }
0x28b3   :  { %v1907_v51 = vpop.permute.xlu0 %1906 }
0x28b4   :  { %v1909_v52 = vadd.f32 %v1907_v51, %v1899_v50 }
0x28b6   :  { %2711 = vtanh.f32 %v1909_v52  ;;  %v2004_v7 = vrot.slane %v1909_v52, 6 }
0x28c0   :  { %v2712_v53 = vpop.eup %2711 }
0x28c1   :  { %1912 = vrot.lane.b32.xlu1 %v2712_v53, %s2848_s25 }
0x2933   :  { %v1913_v54 = vpop.permute.xlu1 %1912 }
0x2934   :  { %v1915_v55 = vmul.f32 %v2710_v46, %v1913_v54 }
0x2936   :  { %v1917_v56 = vrot.slane %v1915_v55, 4 }
0x2938   :  { %1918 = vrot.lane.b32.xlu0 %v1917_v56, %s2849_s3 }
0x29aa   :  { %v1919_v42 = vpop.permute.xlu0 %1918 }
0x29ab   :  { %2454 = vmatmul.mubr.msk.f32.vlgmr.msra.gmra.mrb[16].mxu1 %vm235_vm9, %v1919_v42 }
0x2a7e   :  { %v1988_v57 = vpop.f32.mrb[16].mxu1 }
0x2a7f   :  { %v1993_v58 = vrot.slane %v1988_v57, 2  ;;  %v2455_v59 = vpop.f32.mrb[17].mxu1 }
0x2a81   :  { %v1995_v60 = vadd.f32 %v1993_v58, %v3158_v40  ;;  %v2023_v40 = vld [vmem:[%s3273_s7] sm:$0xff]  ;;  %s2809_s7 = scalar_lea.vmem %s2119_s18, 32 }
0x2a82   :  { %v2576_v13 = vpack.c.bf16 %v2024_v11, %v2023_v40  ;;  %p2810_p4 = scmp.ne.s32.totalorder %s2119_s18, %s2809_s7  ;;  %p2815_p6 = scmp.lt.s32.totalorder %s2809_s7, %s2809_s7 }
0x2a83   :  { %2713 = vtanh.f32 %v1995_v60  ;;  %v2164_v47 = vmul.f32 -1.442695, %v1995_v60 }
0x2a84   :  { %2577 = vmatpush3.bf16.msra.mxu0 %v2576_v13  ;;  %p2816_p7 = por %p2815_p6, %p2814_p5 }
0x2a85   :  { %2715 = vpow2.f32 %v2164_v47  ;;  %2578 = vmatprep.subr.bf16.mxu0 %v2845_v0 }
0x2a86   :  { %p2817_p8 = pnand %p2816_p7, %p2810_p4 }
0x2a88   :  { %2580 = vmatpush3.bf16.msra.mxu0 %v2579_v15 }
0x2a8d   :  { %v2714_v61 = vpop.eup %2713 }
0x2a8e   :  { %2008 = vrot.lane.b32.xlu1 %v2714_v61, %s2848_s25 }
0x2a8f   :  { %v2716_v62 = vpop.eup %2715 }
0x2a90   :  { %v1999_v63 = vadd.f32 1.0, %v2716_v62 }
0x2a92   :  { %2717 = vrcp.f32 %v1999_v63 }
0x2a9c   :  { %v2718_v2 = vpop.eup %2717 }
0x2a9d   :  { %v2006_v8 = vmul.f32 %v2718_v2, %v2004_v7 }
0x2b00   :  { %v2009_v4 = vpop.permute.xlu1 %2008 }
0x2b01   :  { %v2011_v6 = vmul.f32 %v2718_v2, %v2009_v4 }
0x2b03   :  { %2013 = vrot.lane.b32.xlu0 %v2011_v6, %s2849_s3 }
0x2b75   :  { %v2014_v9 = vpop.permute.xlu0 %2013 }
0x2b76   :  { %v2016_v10 = vadd.f32 %v2014_v9, %v2006_v8 }
0x2b78   :  { %2719 = vtanh.f32 %v2016_v10 }
0x2b82   :  { %v2720_v16 = vpop.eup %2719 }
0x2b83   :  { %2019 = vrot.lane.b32.xlu1 %v2720_v16, %s2848_s25 }
0x2bf5   :  { %v2020_v17 = vpop.permute.xlu1 %2019 }
0x2bf6   :  { %v2022_v18 = vmul.f32 %v2718_v2, %v2020_v17 }
0x2bf8   :  { %v2035_v45 = vrot.slane %v2022_v18, 6 }
0x2bfa   :  { %2036 = vrot.lane.b32.xlu0 %v2035_v45, %s2849_s3 }
0x2c6c   :  { %v2037_v20 = vpop.permute.xlu0 %2036 }
0x2c6d   :  { %2465 = vmatmul.mubr.msk.f32.vlgmr.msra.gmra.mrb[18].mxu0 %vm235_vm9, %v2037_v20 }
0x2d40   :  { %v2106_v22 = vpop.f32.mrb[18].mxu0 }
0x2d41   :  { %v2107_v23 = vadd.f32 %v2165_v21, %v2106_v22  ;;  %v2466_v24 = vpop.f32.mrb[19].mxu0 }
0x2d43   :  { %2111 = vst.msk [vmem:[#allocation10] sm:$0x3] %vm2110_vm10, %v2107_v23 }
0x2d44   :  { %2820 = shalt.err (!%p2817_p8)
}
0x2d45   :  { %s2821_s19 = scalar_lea.hbm %s3275_s9, 32 }
0x2d46   :  { %p2822_p9 = scmp.ne.s32.totalorder %s3275_s9, %s2821_s19  ;;  %p2825_p10 = scmp.lt.u32.totalorder %s2821_s19, %s3275_s9 }
0x2d48   :  { %p2827_p11 = pnand %p2825_p10, %p2822_p9 }
0x2d4a   :  { %2830 = shalt.err (!%p2827_p11)
}
0x2d4b   :  { %2121 = dma.vmem_to_hbm [thread:$0]  %s2119_s18, 32, %s3275_s9, [#allocation4]  }
0x2d4c   :  { %2837 = dma.done.wait [#allocation4], 32  }
0x2d4d   :  { %2838 = vsyncadd [#allocation4], 4294967264 }
0x2d4e   :  { %2125 = vsyncpa [#allocation3], 1 }
0x2d4f   :  { %2126 = vsyncpa [#allocation6], 1 }
0x2d50   :  { %2127 = vsyncpa [#allocation9], 1 }
0x2d51   :  { %2128 = vsyncpa [#allocation4], 1 }

</bundles_post_ra>
